<compile_context>
chip_gen: v7x
topology: tpu7x:2x2x1
jax: 0.10.0
libtpu: 0.0.40
codegen_flags: <defaults>
</compile_context>

<pallas_src>
import functools

import jax
import jax.numpy as jnp
from jax import lax
from jax.experimental import pallas as pl
from jax.experimental.pallas import tpu as pltpu


# -----------------------------------------------------------------------------
# Pallas kernel: 3x3 conv (as 3 row-tap matmuls) + bias (folded BN) + PReLU
# -----------------------------------------------------------------------------
def _enc_conv_kernel(x_ref, w_ref, b_ref, a_ref, o_ref, *, W):
    # x_ref: (1, (H+2)*W, 3*C)  bf16  -- padded rows, width-expanded (kx) channels
    # w_ref: (3, 3*C, Cout)     bf16  -- per-ky weight slabs, BN scale pre-folded
    # b_ref: (1, Cout)          f32   -- folded BN bias
    # a_ref: (1, 1)             f32   -- shared PReLU parameter
    # o_ref: (1, H*W, Cout)
    M = o_ref.shape[1]
    Cout = o_ref.shape[2]

    acc = jnp.zeros((M, Cout), jnp.float32)
    for ky in range(3):
        # Row-tap gather: aligned (multiple-of-W) offset slice, no im2col in HBM.
        tap = x_ref[0, ky * W:ky * W + M, :]                       # (M, 3C) bf16
        acc = acc + jnp.dot(tap, w_ref[ky],
                            preferred_element_type=jnp.float32)    # MXU, f32 acc

    y = acc + b_ref[...]                                           # BN bias (f32)
    alpha = a_ref[...]                                             # (1, 1)
    y = jnp.where(y > 0.0, y, y * alpha)                           # PReLU
    o_ref[0] = y.astype(o_ref.dtype)


def _fused_conv3x3_bn_prelu(x_nhwc, w_folded, bias, alpha, out_dtype):
    """3x3 conv (stride 1, pad 1) + folded-BN affine + PReLU, fused in one pallas_call.

    x_nhwc:   (B, H, W, C)
    w_folded: (3, 3, C, Cout) f32, BN scale already folded in
    bias:     (Cout,) f32 (folded BN bias)
    alpha:    scalar PReLU parameter
    """
    B, H, W, C = x_nhwc.shape
    Cout = w_folded.shape[-1]
    Hp = H + 2
    M = H * W

    # Pad spatially (zeros) and expand only along the kx direction (3x, not 9x).
    xp = jnp.pad(x_nhwc.astype(jnp.bfloat16), ((0, 0), (1, 1), (1, 1), (0, 0)))
    xw = jnp.concatenate(
        [xp[:, :, 0:W, :], xp[:, :, 1:W + 1, :], xp[:, :, 2:W + 2, :]], axis=-1)
    xflat = xw.reshape(B, Hp * W, 3 * C)                 # (B, (H+2)*W, 3C) bf16

    w2 = w_folded.astype(jnp.bfloat16).reshape(3, 3 * C, Cout)   # (ky, kx*C+c, cout)
    b2 = bias.reshape(1, Cout).astype(jnp.float32)
    a2 = jnp.reshape(alpha, (1, 1)).astype(jnp.float32)

    out = pl.pallas_call(
        functools.partial(_enc_conv_kernel, W=W),
        out_shape=jax.ShapeDtypeStruct((B, M, Cout), out_dtype),
        grid_spec=pltpu.PrefetchScalarGridSpec(
            num_scalar_prefetch=0,
            grid=(B,),
            in_specs=[
                pl.BlockSpec((1, Hp * W, 3 * C), lambda b: (b, 0, 0)),
                pl.BlockSpec((3, 3 * C, Cout), lambda b: (0, 0, 0)),
                pl.BlockSpec((1, Cout), lambda b: (0, 0)),
                pl.BlockSpec((1, 1), lambda b: (0, 0)),
            ],
            out_specs=pl.BlockSpec((1, M, Cout), lambda b: (b, 0, 0)),
        ),
        compiler_params=pltpu.CompilerParams(
            dimension_semantics=("parallel",),
        ),
    )(xflat, w2, b2, a2)
    return out.reshape(B, H, W, Cout)


# -----------------------------------------------------------------------------
# Forward pass (jitted): NCHW in/out like the PyTorch module
# -----------------------------------------------------------------------------
@jax.jit
def encoder_block_forward(x_nchw, params):
    x = jnp.transpose(x_nchw, (0, 2, 3, 1))              # NCHW -> NHWC
    h = _fused_conv3x3_bn_prelu(x, params["w1f"], params["b1f"], params["alpha"],
                                jnp.bfloat16)            # bf16 inter-layer activation
    y = _fused_conv3x3_bn_prelu(h, params["w2f"], params["b2f"], params["alpha"],
                                jnp.float32)
    return jnp.transpose(y, (0, 3, 1, 2))                # NHWC -> NCHW


# -----------------------------------------------------------------------------
# Deterministic parameters (BN folded on the host; conv bias disabled: use_bias=False)
# -----------------------------------------------------------------------------
def build_params(key, input_nc, middle_nc, output_nc):
    keys = jax.random.split(key, 4)

    def conv_w(k, cin, cout):
        std = (2.0 / (9 * cin)) ** 0.5
        return jax.random.normal(k, (3, 3, cin, cout), jnp.float32) * std

    def bn_fold(k, c):
        k1, k2, k3, k4 = jax.random.split(k, 4)
        gamma = jax.random.uniform(k1, (c,), jnp.float32, 0.8, 1.2)
        beta = jax.random.normal(k2, (c,), jnp.float32) * 0.05
        mean = jax.random.normal(k3, (c,), jnp.float32) * 0.05
        var = jax.random.uniform(k4, (c,), jnp.float32, 0.8, 1.2)
        scale = gamma / jnp.sqrt(var + 1e-5)
        bias = beta - mean * scale
        return scale, bias

    w1 = conv_w(keys[0], input_nc, middle_nc)
    s1, b1 = bn_fold(keys[1], middle_nc)
    w2 = conv_w(keys[2], middle_nc, output_nc)
    s2, b2 = bn_fold(keys[3], output_nc)

    return {
        "w1f": w1 * s1[None, None, None, :],
        "b1f": b1,
        "w2f": w2 * s2[None, None, None, :],
        "b2f": b2,
        # nn.PReLU(): one shared learnable parameter (init 0.25), reused by BOTH
        # activation sites (the same module instance appears twice in the Sequential).
        "alpha": jnp.float32(0.25),
    }


# -----------------------------------------------------------------------------
# Pure-JAX reference (f32) for a correctness cross-check
# -----------------------------------------------------------------------------
def _reference_forward(x_nchw, params):
    def layer(x, wf, bias, alpha):
        z = lax.conv_general_dilated(
            x, wf, window_strides=(1, 1), padding=[(1, 1), (1, 1)],
            dimension_numbers=("NHWC", "HWIO", "NHWC")) + bias
        return jnp.where(z > 0.0, z, alpha * z)

    x = jnp.transpose(x_nchw, (0, 2, 3, 1)).astype(jnp.float32)
    h = layer(x, params["w1f"], params["b1f"], params["alpha"])
    y = layer(h, params["w2f"], params["b2f"], params["alpha"])
    return jnp.transpose(y, (0, 3, 1, 2))


# -----------------------------------------------------------------------------
if __name__ == "__main__":
    key = jax.random.PRNGKey(0)
    pkey, xkey = jax.random.split(key)

    # _EncoderBlock(input_nc=4, middle_nc=32, output_nc=32) on a (2, 4, 16, 16) input.
    INPUT_NC, MIDDLE_NC, OUTPUT_NC = 4, 32, 32
    params = build_params(pkey, INPUT_NC, MIDDLE_NC, OUTPUT_NC)
    x = jax.random.normal(xkey, (2, INPUT_NC, 16, 16), jnp.float32)

    out = jax.block_until_ready(encoder_block_forward(x, params))

    assert out.shape == (2, OUTPUT_NC, 16, 16), out.shape
    assert bool(jnp.all(jnp.isfinite(out)))

    # Cross-check against the f32 XLA reference (loose tolerance: bf16 MXU datapath).
    ref = jax.block_until_ready(_reference_forward(x, params))
    err = float(jnp.max(jnp.abs(out - ref)))
    scale = float(jnp.max(jnp.abs(ref))) + 1e-6
    assert err / scale < 0.06, (err, scale)

    print("KERNEL_OK")
</pallas_src>

<mosaic_0001>
module attributes {stable_mosaic.version = 11 : i64} {
  func.func @_enc_conv_kernel(%arg0: i32, %arg1: memref<1x288x12xbf16, #tpu.memory_space<vmem>>, %arg2: memref<3x12x32xbf16, #tpu.memory_space<vmem>>, %arg3: memref<1x32xf32, #tpu.memory_space<vmem>>, %arg4: memref<1x1xf32, #tpu.memory_space<vmem>>, %arg5: memref<1x256x32xbf16, #tpu.memory_space<vmem>>) attributes {dimension_semantics = [#tpu.dimension_semantics<parallel>], iteration_bounds = array<i64: 2>, scalar_prefetch = 0 : i64, scratch_operands = 0 : i64, tpu.core_type = #tpu.core_type<tc>, window_params = [{transform_indices = @transform_0, window_bounds = array<i64: 1, 288, 12>}, {pipeline_mode = #tpu.pipeline_mode<synchronous>, transform_indices = @transform_1, window_bounds = array<i64: 3, 12, 32>}, {pipeline_mode = #tpu.pipeline_mode<synchronous>, transform_indices = @transform_2, window_bounds = array<i64: 1, 32>}, {pipeline_mode = #tpu.pipeline_mode<synchronous>, transform_indices = @transform_3, window_bounds = array<i64: 1, 1>}, {transform_indices = @transform_4, window_bounds = array<i64: 1, 256, 32>}]} {
    %cst = arith.constant 0.000000e+00 : f32
    %0 = vector.broadcast %cst : f32 to vector<256x32xf32>
    %c0 = arith.constant 0 : index
    %c0_0 = arith.constant 0 : index
    %c0_1 = arith.constant 0 : index
    %1 = vector.load %arg1[%c0, %c0_0, %c0_1] : memref<1x288x12xbf16, #tpu.memory_space<vmem>>, vector<1x256x12xbf16>
    %2 = vector.shape_cast %1 : vector<1x256x12xbf16> to vector<256x12xbf16>
    %c0_2 = arith.constant 0 : index
    %c0_3 = arith.constant 0 : index
    %c0_4 = arith.constant 0 : index
    %3 = vector.load %arg2[%c0_2, %c0_3, %c0_4] : memref<3x12x32xbf16, #tpu.memory_space<vmem>>, vector<1x12x32xbf16>
    %4 = vector.shape_cast %3 : vector<1x12x32xbf16> to vector<12x32xbf16>
    %cst_5 = arith.constant dense<0.000000e+00> : vector<256x32xf32>
    %5 = tpu.matmul %2, %4, %cst_5 {dimension_numbers = #tpu.dot_dimension_numbers<[1], [0], [0], [1], [0, 0, 1, 1], [], []>} : vector<256x12xbf16>, vector<12x32xbf16>, vector<256x32xf32> -> vector<256x32xf32>
    %6 = arith.addf %0, %5 : vector<256x32xf32>
    %c0_6 = arith.constant 0 : index
    %c16 = arith.constant 16 : index
    %c0_7 = arith.constant 0 : index
    %7 = vector.load %arg1[%c0_6, %c16, %c0_7] : memref<1x288x12xbf16, #tpu.memory_space<vmem>>, vector<1x256x12xbf16>
    %8 = vector.shape_cast %7 : vector<1x256x12xbf16> to vector<256x12xbf16>
    %c1 = arith.constant 1 : index
    %c0_8 = arith.constant 0 : index
    %c0_9 = arith.constant 0 : index
    %9 = vector.load %arg2[%c1, %c0_8, %c0_9] : memref<3x12x32xbf16, #tpu.memory_space<vmem>>, vector<1x12x32xbf16>
    %10 = vector.shape_cast %9 : vector<1x12x32xbf16> to vector<12x32xbf16>
    %cst_10 = arith.constant dense<0.000000e+00> : vector<256x32xf32>
    %11 = tpu.matmul %8, %10, %cst_10 {dimension_numbers = #tpu.dot_dimension_numbers<[1], [0], [0], [1], [0, 0, 1, 1], [], []>} : vector<256x12xbf16>, vector<12x32xbf16>, vector<256x32xf32> -> vector<256x32xf32>
    %12 = arith.addf %6, %11 : vector<256x32xf32>
    %c0_11 = arith.constant 0 : index
    %c32 = arith.constant 32 : index
    %c0_12 = arith.constant 0 : index
    %13 = vector.load %arg1[%c0_11, %c32, %c0_12] : memref<1x288x12xbf16, #tpu.memory_space<vmem>>, vector<1x256x12xbf16>
    %14 = vector.shape_cast %13 : vector<1x256x12xbf16> to vector<256x12xbf16>
    %c2 = arith.constant 2 : index
    %c0_13 = arith.constant 0 : index
    %c0_14 = arith.constant 0 : index
    %15 = vector.load %arg2[%c2, %c0_13, %c0_14] : memref<3x12x32xbf16, #tpu.memory_space<vmem>>, vector<1x12x32xbf16>
    %16 = vector.shape_cast %15 : vector<1x12x32xbf16> to vector<12x32xbf16>
    %cst_15 = arith.constant dense<0.000000e+00> : vector<256x32xf32>
    %17 = tpu.matmul %14, %16, %cst_15 {dimension_numbers = #tpu.dot_dimension_numbers<[1], [0], [0], [1], [0, 0, 1, 1], [], []>} : vector<256x12xbf16>, vector<12x32xbf16>, vector<256x32xf32> -> vector<256x32xf32>
    %18 = arith.addf %12, %17 : vector<256x32xf32>
    %c0_16 = arith.constant 0 : index
    %c0_17 = arith.constant 0 : index
    %19 = vector.load %arg3[%c0_16, %c0_17] : memref<1x32xf32, #tpu.memory_space<vmem>>, vector<1x32xf32>
    %20 = vector.broadcast %19 : vector<1x32xf32> to vector<256x32xf32>
    %21 = arith.addf %18, %20 : vector<256x32xf32>
    %c0_18 = arith.constant 0 : index
    %c0_19 = arith.constant 0 : index
    %22 = vector.load %arg4[%c0_18, %c0_19] : memref<1x1xf32, #tpu.memory_space<vmem>>, vector<1x1xf32>
    %cst_20 = arith.constant 0.000000e+00 : f32
    %23 = vector.broadcast %cst_20 : f32 to vector<256x32xf32>
    %24 = arith.cmpf ogt, %21, %23 : vector<256x32xf32>
    %25 = vector.broadcast %22 : vector<1x1xf32> to vector<256x32xf32>
    %26 = arith.mulf %21, %25 : vector<256x32xf32>
    %27 = arith.select %24, %21, %26 : vector<256x32xi1>, vector<256x32xf32>
    %28 = arith.truncf %27 : vector<256x32xf32> to vector<256x32xbf16>
    %c0_21 = arith.constant 0 : index
    %c0_22 = arith.constant 0 : index
    %c0_23 = arith.constant 0 : index
    %29 = vector.load %arg5[%c0_21, %c0_22, %c0_23] : memref<1x256x32xbf16, #tpu.memory_space<vmem>>, vector<1x256x32xbf16>
    %30 = vector.shape_cast %29 : vector<1x256x32xbf16> to vector<256x32xbf16>
    %31 = vector.shape_cast %28 : vector<256x32xbf16> to vector<1x256x32xbf16>
    tpu.vector_store %arg5[%c0_21, %c0_22, %c0_23], %31 {strides = array<i32>} : memref<1x256x32xbf16, #tpu.memory_space<vmem>>, vector<1x256x32xbf16>,
    return
  }
  func.func @transform_0(%arg0: i32) -> (i32, i32, i32) {
    %c0_i32 = arith.constant 0 : i32
    %c0_i32_0 = arith.constant 0 : i32
    %c0_i32_1 = arith.constant 0 : i32
    return %arg0, %c0_i32, %c0_i32_0 : i32, i32, i32
  }
  func.func @transform_1(%arg0: i32) -> (i32, i32, i32) {
    %c0_i32 = arith.constant 0 : i32
    %c0_i32_0 = arith.constant 0 : i32
    %c0_i32_1 = arith.constant 0 : i32
    %c0_i32_2 = arith.constant 0 : i32
    return %c0_i32, %c0_i32_0, %c0_i32_1 : i32, i32, i32
  }
  func.func @transform_2(%arg0: i32) -> (i32, i32) {
    %c0_i32 = arith.constant 0 : i32
    %c0_i32_0 = arith.constant 0 : i32
    %c0_i32_1 = arith.constant 0 : i32
    return %c0_i32, %c0_i32_0 : i32, i32
  }
  func.func @transform_3(%arg0: i32) -> (i32, i32) {
    %c0_i32 = arith.constant 0 : i32
    %c0_i32_0 = arith.constant 0 : i32
    %c0_i32_1 = arith.constant 0 : i32
    return %c0_i32, %c0_i32_0 : i32, i32
  }
  func.func @transform_4(%arg0: i32) -> (i32, i32, i32) {
    %c0_i32 = arith.constant 0 : i32
    %c0_i32_0 = arith.constant 0 : i32
    %c0_i32_1 = arith.constant 0 : i32
    return %arg0, %c0_i32, %c0_i32_0 : i32, i32, i32
  }
}

module attributes {stable_mosaic.version = 11 : i64} {
  func.func @_enc_conv_kernel(%arg0: i32, %arg1: memref<1x288x96xbf16, #tpu.memory_space<vmem>>, %arg2: memref<3x96x32xbf16, #tpu.memory_space<vmem>>, %arg3: memref<1x32xf32, #tpu.memory_space<vmem>>, %arg4: memref<1x1xf32, #tpu.memory_space<vmem>>, %arg5: memref<1x256x32xf32, #tpu.memory_space<vmem>>) attributes {dimension_semantics = [#tpu.dimension_semantics<parallel>], iteration_bounds = array<i64: 2>, scalar_prefetch = 0 : i64, scratch_operands = 0 : i64, tpu.core_type = #tpu.core_type<tc>, window_params = [{transform_indices = @transform_0, window_bounds = array<i64: 1, 288, 96>}, {pipeline_mode = #tpu.pipeline_mode<synchronous>, transform_indices = @transform_1, window_bounds = array<i64: 3, 96, 32>}, {pipeline_mode = #tpu.pipeline_mode<synchronous>, transform_indices = @transform_2, window_bounds = array<i64: 1, 32>}, {pipeline_mode = #tpu.pipeline_mode<synchronous>, transform_indices = @transform_3, window_bounds = array<i64: 1, 1>}, {transform_indices = @transform_4, window_bounds = array<i64: 1, 256, 32>}]} {
    %cst = arith.constant 0.000000e+00 : f32
    %0 = vector.broadcast %cst : f32 to vector<256x32xf32>
    %c0 = arith.constant 0 : index
    %c0_0 = arith.constant 0 : index
    %c0_1 = arith.constant 0 : index
    %1 = vector.load %arg1[%c0, %c0_0, %c0_1] : memref<1x288x96xbf16, #tpu.memory_space<vmem>>, vector<1x256x96xbf16>
    %2 = vector.shape_cast %1 : vector<1x256x96xbf16> to vector<256x96xbf16>
    %c0_2 = arith.constant 0 : index
    %c0_3 = arith.constant 0 : index
    %c0_4 = arith.constant 0 : index
    %3 = vector.load %arg2[%c0_2, %c0_3, %c0_4] : memref<3x96x32xbf16, #tpu.memory_space<vmem>>, vector<1x96x32xbf16>
    %4 = vector.shape_cast %3 : vector<1x96x32xbf16> to vector<96x32xbf16>
    %cst_5 = arith.constant dense<0.000000e+00> : vector<256x32xf32>
    %5 = tpu.matmul %2, %4, %cst_5 {dimension_numbers = #tpu.dot_dimension_numbers<[1], [0], [0], [1], [0, 0, 1, 1], [], []>} : vector<256x96xbf16>, vector<96x32xbf16>, vector<256x32xf32> -> vector<256x32xf32>
    %6 = arith.addf %0, %5 : vector<256x32xf32>
    %c0_6 = arith.constant 0 : index
    %c16 = arith.constant 16 : index
    %c0_7 = arith.constant 0 : index
    %7 = vector.load %arg1[%c0_6, %c16, %c0_7] : memref<1x288x96xbf16, #tpu.memory_space<vmem>>, vector<1x256x96xbf16>
    %8 = vector.shape_cast %7 : vector<1x256x96xbf16> to vector<256x96xbf16>
    %c1 = arith.constant 1 : index
    %c0_8 = arith.constant 0 : index
    %c0_9 = arith.constant 0 : index
    %9 = vector.load %arg2[%c1, %c0_8, %c0_9] : memref<3x96x32xbf16, #tpu.memory_space<vmem>>, vector<1x96x32xbf16>
    %10 = vector.shape_cast %9 : vector<1x96x32xbf16> to vector<96x32xbf16>
    %cst_10 = arith.constant dense<0.000000e+00> : vector<256x32xf32>
    %11 = tpu.matmul %8, %10, %cst_10 {dimension_numbers = #tpu.dot_dimension_numbers<[1], [0], [0], [1], [0, 0, 1, 1], [], []>} : vector<256x96xbf16>, vector<96x32xbf16>, vector<256x32xf32> -> vector<256x32xf32>
    %12 = arith.addf %6, %11 : vector<256x32xf32>
    %c0_11 = arith.constant 0 : index
    %c32 = arith.constant 32 : index
    %c0_12 = arith.constant 0 : index
    %13 = vector.load %arg1[%c0_11, %c32, %c0_12] : memref<1x288x96xbf16, #tpu.memory_space<vmem>>, vector<1x256x96xbf16>
    %14 = vector.shape_cast %13 : vector<1x256x96xbf16> to vector<256x96xbf16>
    %c2 = arith.constant 2 : index
    %c0_13 = arith.constant 0 : index
    %c0_14 = arith.constant 0 : index
    %15 = vector.load %arg2[%c2, %c0_13, %c0_14] : memref<3x96x32xbf16, #tpu.memory_space<vmem>>, vector<1x96x32xbf16>
    %16 = vector.shape_cast %15 : vector<1x96x32xbf16> to vector<96x32xbf16>
    %cst_15 = arith.constant dense<0.000000e+00> : vector<256x32xf32>
    %17 = tpu.matmul %14, %16, %cst_15 {dimension_numbers = #tpu.dot_dimension_numbers<[1], [0], [0], [1], [0, 0, 1, 1], [], []>} : vector<256x96xbf16>, vector<96x32xbf16>, vector<256x32xf32> -> vector<256x32xf32>
    %18 = arith.addf %12, %17 : vector<256x32xf32>
    %c0_16 = arith.constant 0 : index
    %c0_17 = arith.constant 0 : index
    %19 = vector.load %arg3[%c0_16, %c0_17] : memref<1x32xf32, #tpu.memory_space<vmem>>, vector<1x32xf32>
    %20 = vector.broadcast %19 : vector<1x32xf32> to vector<256x32xf32>
    %21 = arith.addf %18, %20 : vector<256x32xf32>
    %c0_18 = arith.constant 0 : index
    %c0_19 = arith.constant 0 : index
    %22 = vector.load %arg4[%c0_18, %c0_19] : memref<1x1xf32, #tpu.memory_space<vmem>>, vector<1x1xf32>
    %cst_20 = arith.constant 0.000000e+00 : f32
    %23 = vector.broadcast %cst_20 : f32 to vector<256x32xf32>
    %24 = arith.cmpf ogt, %21, %23 : vector<256x32xf32>
    %25 = vector.broadcast %22 : vector<1x1xf32> to vector<256x32xf32>
    %26 = arith.mulf %21, %25 : vector<256x32xf32>
    %27 = arith.select %24, %21, %26 : vector<256x32xi1>, vector<256x32xf32>
    %c0_21 = arith.constant 0 : index
    %c0_22 = arith.constant 0 : index
    %c0_23 = arith.constant 0 : index
    %28 = vector.load %arg5[%c0_21, %c0_22, %c0_23] : memref<1x256x32xf32, #tpu.memory_space<vmem>>, vector<1x256x32xf32>
    %29 = vector.shape_cast %28 : vector<1x256x32xf32> to vector<256x32xf32>
    %30 = vector.shape_cast %27 : vector<256x32xf32> to vector<1x256x32xf32>
    tpu.vector_store %arg5[%c0_21, %c0_22, %c0_23], %30 {strides = array<i32>} : memref<1x256x32xf32, #tpu.memory_space<vmem>>, vector<1x256x32xf32>,
    return
  }
  func.func @transform_0(%arg0: i32) -> (i32, i32, i32) {
    %c0_i32 = arith.constant 0 : i32
    %c0_i32_0 = arith.constant 0 : i32
    %c0_i32_1 = arith.constant 0 : i32
    return %arg0, %c0_i32, %c0_i32_0 : i32, i32, i32
  }
  func.func @transform_1(%arg0: i32) -> (i32, i32, i32) {
    %c0_i32 = arith.constant 0 : i32
    %c0_i32_0 = arith.constant 0 : i32
    %c0_i32_1 = arith.constant 0 : i32
    %c0_i32_2 = arith.constant 0 : i32
    return %c0_i32, %c0_i32_0, %c0_i32_1 : i32, i32, i32
  }
  func.func @transform_2(%arg0: i32) -> (i32, i32) {
    %c0_i32 = arith.constant 0 : i32
    %c0_i32_0 = arith.constant 0 : i32
    %c0_i32_1 = arith.constant 0 : i32
    return %c0_i32, %c0_i32_0 : i32, i32
  }
  func.func @transform_3(%arg0: i32) -> (i32, i32) {
    %c0_i32 = arith.constant 0 : i32
    %c0_i32_0 = arith.constant 0 : i32
    %c0_i32_1 = arith.constant 0 : i32
    return %c0_i32, %c0_i32_0 : i32, i32
  }
  func.func @transform_4(%arg0: i32) -> (i32, i32, i32) {
    %c0_i32 = arith.constant 0 : i32
    %c0_i32_0 = arith.constant 0 : i32
    %c0_i32_1 = arith.constant 0 : i32
    return %arg0, %c0_i32, %c0_i32_0 : i32, i32, i32
  }
}

</mosaic_0001>

<bundles_post_ra>
// kernel: encoder_block_forward.3
= control target key start
LH: loop header
LB: loop body
LE: loop exit
PB: predicated region body
PF: predicated region fallthrough
CT: control target
= control target key end

     0   :  { %s2459_s0 = inlined_call_operand.vmem [shape: bf16[2,288,96], index: 0, kind: input, shape index: {}]   ;;  %s2460_s1 = inlined_call_operand.vmem [shape: bf16[3,96,32], index: 1, kind: input, shape index: {}]   ;;  %s2461_s2 = inlined_call_operand.vmem [shape: f32[1,32], index: 2, kind: input, shape index: {}]   ;;  %s2462_s3 = inlined_call_operand.<no memory space> [shape: f32[1,1], index: 3, kind: input, shape index: {}]   ;;  %s2463_s4 = inlined_call_operand.hbm [shape: f32[2,256,32], index: 4, kind: output, shape index: {}]  }
   0x1   :  { %v9_v0 = vstv %s2462_s3 }
   0x2   :  { %10 = vst [vmem:[#allocation2] sm:$0x1] %v9_v0 }
   0x3   :  { %11 = vsyncpa [#allocation4], 0 }
   0x4   :  { %13 = vsyncpa [#allocation4 + $0x1], 0  ;;  %s2047_s17 = smov 0   ;;  %s2049_s18 = smov 0  }
   0x5   :  { %s2051_s19 = smov 0   ;;  %s2053_s20 = smov 0  }
   0x6 LB: > { %s2068_s3 = sadd.s32 4294967295, %s2013_s20   ;;  %s1445_s21 = sadd.s32 4294967294, %s2013_s20   ;;  %s2013_s20 = sphi %s2053_s20, %s2469_s20   ;;  %s2009_s19 = sphi %s2051_s19, %s2468_s19   ;;  %s2005_s18 = sphi %s2049_s18, %s2467_s18   ;;  %s2001_s17 = sphi %s2047_s17, %s2466_s17  }
   0x7   : > { %s2072_s22 = sadd.s32 1, %s2013_s20   ;;  %s115_s23 = sadd.s32 1, %s2009_s19 }
   0x8   : > { %s112_s24 = ssub.s32 %s2013_s20, %s2072_s22  ;;  %p125_p0 = scmp.ne.s32.totalorder %s2009_s19, %s2005_s18 }
   0x9   : > { %p113_p1 = scmp.eq.s32.totalorder %s112_s24, 0  ;;  %p126_p2 = scmp.eq.s32.totalorder %s2068_s3, 1 }
   0xa   : > { %p131_p3 = scmp.ne.s32.totalorder %s2005_s18, %s2001_s17  ;;  %p132_p4 = scmp.eq.s32.totalorder %s1445_s21, 1 }
   0xb   : > { %s2083_s25 = scalar_select %p113_p1, %s2009_s19, %s115_s23  }
   0xc   : > { %p2085_p5 = por %p126_p2, %p125_p0  ;;  %p2089_p6 = por %p132_p4, %p131_p3 }
   0xd   : > { %p1448_p7 = scmp.ge.s32.totalorder %s2013_s20, 1  ;;  %p167_p8 = scmp.lt.s32.totalorder %s2013_s20, 3 }
   0xf   : > { %p168_p9 = pnand %p1448_p7, %p167_p8 }
  0x10   : > { %v1900_v1 = vld [vmem:[%s2460_s1 + $0x30] sm:$0xff] (!%p168_p9)   ;;  %p193_p10 = scmp.lt.s32.totalorder (!%p168_p9), %s2068_s3, 1  ;;  %v1901_v2 = vld [vmem:[%s2460_s1] sm:$0xff] (!%p168_p9)   ;;  %v1902_v3 = vld [vmem:[%s2460_s1 + $0x38] sm:$0xff] (!%p168_p9)   ;;  %v2015_v7 = vmov (!%p168_p9), 0   ;;  %vm374_vm0 = vcmask (!%p168_p9), 785408  }
  0x11   : > { %171 = sbr.rel (%p168_p9) target bundleno = 367 (0x16f), region = 36  ;;  %1648 = vmatprep.subr.bf16.mxu1 (!%p168_p9), %v1900_v1  ;;  %1692 = vmatprep.subr.bf16.mxu0 (!%p168_p9), %v1901_v2  ;;  %v1903_v4 = vld [vmem:[%s2460_s1 + $0x8] sm:$0xff] (!%p168_p9)   ;;  %v1904_v5 = vld [vmem:[%s2460_s1 + $0x40] sm:$0xff] (!%p168_p9)   ;;  %v1905_v6 = vld [vmem:[%s2460_s1 + $0x10] sm:$0xff] (!%p168_p9)   ;;  %vm1336_vm2 = vcmask (!%p168_p9), 261120   ;;  %s1581_s12 = sshll.u32 (!%p168_p9), %s2068_s3, 12 }
  0x12   : > { %1649 = vmatpush3.bf16.msra.mxu1 (!%p168_p9), %v1900_v1  ;;  %1693 = vmatpush3.bf16.msra.mxu0 (!%p168_p9), %v1901_v2  ;;  %v1906_v8 = vld [vmem:[%s2460_s1 + $0x48] sm:$0xff] (!%p168_p9)   ;;  %v1907_v9 = vld [vmem:[%s2460_s1 + $0x18] sm:$0xff] (!%p168_p9)   ;;  %v1908_v10 = vld [vmem:[%s2460_s1 + $0x50] sm:$0xff] (!%p168_p9)   ;;  %s2016_s23 = smov (!%p168_p9), [#allocation3]  }
  0x13   : > { %1650 = vmatprep.subr.bf16.mxu1 (!%p168_p9), %v1902_v3  ;;  %1694 = vmatprep.subr.bf16.mxu0 (!%p168_p9), %v1903_v4  ;;  %v2132_v11 = vld [vmem:[%s2460_s1 + $0x20] sm:$0xff] (!%p168_p9)   ;;  %v1910_v14 = vld [vmem:[%s2460_s1 + $0x58] sm:$0xff] (!%p168_p9)   ;;  %v1911_v15 = vld [vmem:[%s2460_s1 + $0x28] sm:$0xff] (!%p168_p9)   ;;  %s1955_s24 = sshll.u32 (!%p168_p9), %s2016_s23, 4  ;;  %s1956_s24 = int_to_ptr.vmem [resolvable:$false] %s1955_s24 }
  0x14   : > { %1899 = vset.pattern.permute.xlu0 (!%p168_p9), %v2015_v7  ;;  %v1915_v16 = vld [vmem:[%s2460_s1 + $0x60] sm:$0xff] (!%p168_p9)   ;;  %v1916_v19 = vld [vmem:[%s2460_s1 + $0x68] sm:$0xff] (!%p168_p9)   ;;  %v1919_v20 = vld [vmem:[%s2460_s1 + $0x70] sm:$0xff] (!%p168_p9)   ;;  %s1957_s28 = scalar_lea.vmem (!%p168_p9), %s1956_s24, 8192 }
  0x15   : > { %v1922_v23 = vld [vmem:[%s2460_s1 + $0x78] sm:$0xff] (!%p168_p9)   ;;  %v1923_v24 = vld [vmem:[%s2460_s1 + $0x80] sm:$0xff] (!%p168_p9)   ;;  %v1926_v27 = vld [vmem:[%s2460_s1 + $0x88] sm:$0xff] (!%p168_p9)  }
  0x16   : > { %1651 = vmatpush3.bf16.msra.mxu1 (!%p168_p9), %v1902_v3  ;;  %1695 = vmatpush3.bf16.msra.mxu0 (!%p168_p9), %v1903_v4  ;;  %v1575_v31 = vld [vmem:[#allocation2] ss:$0 sm:$0xff] (!%p168_p9) }
  0x17   : > { %1652 = vmatprep.subr.bf16.mxu1 (!%p168_p9), %v1904_v5  ;;  %1696 = vmatprep.subr.bf16.mxu0 (!%p168_p9), %v1905_v6  ;;  %v2263_v7 = vld [vmem:[%s2461_s2] ss:$0 sm:$0xff] (!%p168_p9) }
  0x18   : > { %s194_s8 = scalar_select %p193_p10, %s2068_s3, 1  ;;  %1269 = vperm.xlu0 %1899, %v1575_v31  }
  0x1a   : > { %s1856_s15 = smul.u32 144, %s194_s8  ;;  %1653 = vmatpush3.bf16.msra.mxu1 %v1904_v5  ;;  %1697 = vmatpush3.bf16.msra.mxu0 %v1905_v6 }
  0x1b   : > { %1654 = vmatprep.subr.bf16.mxu1 %v1906_v8  ;;  %1698 = vmatprep.subr.bf16.mxu0 %v1907_v9 }
  0x1c   : > { %s2124_s30 = scalar_lea.vmem %s2459_s0, %s1856_s15  ;;  %s2406_s15 = scalar_lea.hbm %s2463_s4, %s1581_s12 }
  0x1d   : > { %v1912_v12 = vld [vmem:[%s2124_s30 + $0x8] sm:$0xff]   ;;  %v1913_v13 = vld [vmem:[%s2124_s30] sm:$0xff]   ;;  %v1914_v17 = vld [vmem:[%s2124_s30 + $0x10] sm:$0xff]  }
  0x1e   : > { %1660 = vmatprep.mubr.msk.bf16.mxu1 %vm374_vm0, %v1912_v12  ;;  %1655 = vmatpush3.bf16.msra.mxu1 %v1906_v8  ;;  %v1917_v18 = vld [vmem:[%s2124_s30 + $0x18] sm:$0xff]   ;;  %v1918_v21 = vld [vmem:[%s2124_s30 + $0x20] sm:$0xff]   ;;  %v1920_v22 = vld [vmem:[%s2124_s30 + $0x28] sm:$0xff]  }
  0x1f   : > { %1704 = vmatprep.mubr.msk.bf16.mxu0 %vm374_vm0, %v1913_v13  ;;  %1699 = vmatpush3.bf16.msra.mxu0 %v1907_v9  ;;  %v1921_v25 = vld [vmem:[%s2124_s30 + $0x30] sm:$0xff]   ;;  %v1924_v26 = vld [vmem:[%s2124_s30 + $0x38] sm:$0xff]   ;;  %v1925_v28 = vld [vmem:[%s2124_s30 + $0x40] sm:$0xff]  }
  0x20   : > { %1656 = vmatprep.subr.bf16.mxu1 %v1908_v10  ;;  %1700 = vmatprep.subr.bf16.mxu0 %v2132_v11  ;;  %v1927_v29 = vld [vmem:[%s2124_s30 + $0x48] sm:$0xff]   ;;  %v1928_v30 = vld [vmem:[%s2124_s30 + $0x10] sm:$0xff]   ;;  %v1930_v33 = vld [vmem:[%s2124_s30 + $0x18] sm:$0xff]  }
  0x21   : > { %v1929_v32 = vld [vmem:[%s2124_s30 + $0x50] sm:$0xff]   ;;  %v1931_v34 = vld [vmem:[%s2124_s30 + $0x58] sm:$0xff]   ;;  %v1932_v35 = vld [vmem:[%s2124_s30 + $0x20] sm:$0xff]  }
  0x22   : > { %1657 = vmatpush3.bf16.msra.mxu1 %v1908_v10  ;;  %v1933_v36 = vld [vmem:[%s2124_s30 + $0x60] sm:$0xff]   ;;  %v1934_v37 = vld [vmem:[%s2124_s30 + $0x28] sm:$0xff]   ;;  %v1936_v39 = vld [vmem:[%s2124_s30 + $0x30] sm:$0xff]  }
  0x23   : > { %1701 = vmatpush3.bf16.msra.mxu0 %v2132_v11  ;;  %1658 = vmatprep.subr.bf16.mxu1 %v1910_v14  ;;  %v1935_v38 = vld [vmem:[%s2124_s30 + $0x68] sm:$0xff]   ;;  %v1937_v40 = vld [vmem:[%s2124_s30 + $0x70] sm:$0xff]   ;;  %v1938_v41 = vld [vmem:[%s2124_s30 + $0x38] sm:$0xff]  }
  0x24   : > { %1702 = vmatprep.subr.bf16.mxu0 %v1911_v15  ;;  %v1939_v42 = vld [vmem:[%s2124_s30 + $0x78] sm:$0xff]   ;;  %v1940_v43 = vld [vmem:[%s2124_s30 + $0x40] sm:$0xff]   ;;  %v1942_v45 = vld [vmem:[%s2124_s30 + $0x48] sm:$0xff]  }
  0x25   : > { %v1941_v44 = vld [vmem:[%s2124_s30 + $0x80] sm:$0xff]   ;;  %v1943_v46 = vld [vmem:[%s2124_s30 + $0x50] sm:$0xff]   ;;  %v1944_v47 = vld [vmem:[%s2124_s30 + $0x58] sm:$0xff]  }
  0x26   : > { %1659 = vmatpush3.bf16.msra.mxu1 %v1910_v14  ;;  %v1945_v48 = vld [vmem:[%s2124_s30 + $0x60] sm:$0xff]   ;;  %v1946_v49 = vld [vmem:[%s2124_s30 + $0x68] sm:$0xff]   ;;  %v1947_v50 = vld [vmem:[%s2124_s30 + $0x70] sm:$0xff]  }
  0x27   : > { %1703 = vmatpush3.bf16.msra.mxu0 %v1911_v15  ;;  %1780 = vmatprep.subr.bf16.mxu1 %v1901_v2  ;;  %v1948_v51 = vld [vmem:[%s2124_s30 + $0x78] sm:$0xff]   ;;  %v1949_v52 = vld [vmem:[%s2124_s30 + $0x80] sm:$0xff]   ;;  %v1950_v53 = vld [vmem:[%s2124_s30 + $0x88] sm:$0xff]   ;;  %s190_s30 = sand.u32 1, %s2005_s18  }
  0x28   : > { %1736 = vmatprep.subr.bf16.mxu0 %v1915_v16  ;;  %s1449_s10 = sshll.u32 %s190_s30, 8  ;;  %s2418_s16 = scalar_lea.sflag [#allocation4], %s190_s30 }
  0x29   : > { %1661 = vmatmul.mubr.msk.bf16.vlgmr.msra.gmra.mrb[0].mxu1 %vm374_vm0, %v1914_v17  ;;  %s2277_s11 = scalar_lea.vmem [#allocation3], %s1449_s10 }
  0x2a   : > { %1705 = vmatmul.mubr.msk.bf16.vlgmr.msra.gmra.mrb[0].mxu0 %vm374_vm0, %v1912_v12  ;;  %1786 = vmatpush3.bf16.msra.mxu1 %v1901_v2  ;;  %s1383_s13 = sshll.u32 %s2277_s11, 4  ;;  %s2408_s13 = int_to_ptr.vmem [resolvable:$true] %s1383_s13 }
  0x2b   : > { %1737 = vmatpush3.bf16.msra.mxu0 %v1915_v16  ;;  %1664 = vmatprep.mubr.msk.bf16.mxu1 %vm374_vm0, %v1917_v18  ;;  %s1951_s21 = scalar_lea.vmem %s2408_s13, 4096  ;;  %p1958_p0 = scmp.lt.s32.totalorder %s2408_s13, %s1956_s24 }
  0x2c   : > { %1738 = vmatprep.subr.bf16.mxu0 %v1916_v19  ;;  %1708 = vmatprep.mubr.msk.bf16.mxu0 %vm374_vm0, %v1914_v17  ;;  %p1952_p11 = scmp.ne.s32.totalorder %s2408_s13, %s1951_s21  ;;  %p1959_p1 = scmp.lt.s32.totalorder %s1957_s28, %s1951_s21 }
  0x2d   : > { %1781 = vmatprep.subr.bf16.mxu1 %v1903_v4 }
  0x2e   : > { %1787 = vmatpush3.bf16.msra.mxu1 %v1903_v4  ;;  %p1953_p12 = pnand %p1952_p11, %p2085_p5  ;;  %p1960_p2 = por %p1959_p1, %p1958_p0 }
  0x2f   : > { %1739 = vmatpush3.bf16.msra.mxu0 %v1916_v19  ;;  %1782 = vmatprep.subr.bf16.mxu1 %v1905_v6 }
  0x30   : > { %1740 = vmatprep.subr.bf16.mxu0 %v1919_v20  ;;  %p1954_p13 = pneg %p1953_p12 }
  0x31   : > { %1665 = vmatmul.mubr.msk.bf16.gmra.mrb[4].mxu1 %vm374_vm0, %v1918_v21 }
  0x32   : > { %1709 = vmatmul.mubr.msk.bf16.gmra.mrb[4].mxu0 %vm374_vm0, %v1917_v18  ;;  %1668 = vmatprep.mubr.msk.bf16.mxu1 %vm374_vm0, %v1920_v22  ;;  %p1961_p3 = pnand %p1960_p2, %p1954_p13 }
  0x33   : > { %1741 = vmatpush3.bf16.msra.mxu0 %v1919_v20  ;;  %1712 = vmatprep.mubr.msk.bf16.mxu0 %vm374_vm0, %v1918_v21 }
  0x34   : > { %1742 = vmatprep.subr.bf16.mxu0 %v1922_v23  ;;  %1788 = vmatpush3.bf16.msra.mxu1 %v1905_v6 }
  0x35   : > { %1783 = vmatprep.subr.bf16.mxu1 %v1907_v9 }
  0x37   : > { %1743 = vmatpush3.bf16.msra.mxu0 %v1922_v23 }
  0x38   : > { %1744 = vmatprep.subr.bf16.mxu0 %v1923_v24  ;;  %1789 = vmatpush3.bf16.msra.mxu1 %v1907_v9 }
  0x39   : > { %1669 = vmatmul.mubr.msk.bf16.gmra.mrb[8].mxu1 %vm374_vm0, %v1921_v25  ;;  %1784 = vmatprep.subr.bf16.mxu1 %v2132_v11 }
  0x3a   : > { %1713 = vmatmul.mubr.msk.bf16.gmra.mrb[8].mxu0 %vm374_vm0, %v1920_v22  ;;  %1672 = vmatprep.mubr.msk.bf16.mxu1 %vm374_vm0, %v1924_v26 }
  0x3b   : > { %1716 = vmatprep.mubr.msk.bf16.mxu0 %vm374_vm0, %v1921_v25  ;;  %1745 = vmatpush3.bf16.msra.mxu0 %v1923_v24 }
  0x3c   : > { %1746 = vmatprep.subr.bf16.mxu0 %v1926_v27  ;;  %1790 = vmatpush3.bf16.msra.mxu1 %v2132_v11 }
  0x3d   : > { %1785 = vmatprep.subr.bf16.mxu1 %v1911_v15 }
  0x3f   : > { %1747 = vmatpush3.bf16.msra.mxu0 %v1926_v27 }
  0x40   : > { %1791 = vmatpush3.bf16.msra.mxu1 %v1911_v15 }
  0x41   : > { %1673 = vmatmul.mubr.msk.bf16.gmra.mrb[12].mxu1 %vm374_vm0, %v1925_v28 }
  0x42   : > { %1717 = vmatmul.mubr.msk.bf16.gmra.mrb[12].mxu0 %vm374_vm0, %v1924_v26  ;;  %1676 = vmatprep.mubr.msk.bf16.mxu1 %vm374_vm0, %v1927_v29 }
  0x43   : > { %1748 = vmatprep.mubr.msk.bf16.mxu0 %vm374_vm0, %v1928_v30 }
  0x49   : > { %1677 = vmatmul.mubr.msk.bf16.gmra.mrb[16].mxu1 %vm374_vm0, %v1929_v32 }
  0x4a   : > { %1749 = vmatmul.mubr.msk.bf16.vlgmr.msra.gmra.mrb[0].mxu0 %vm374_vm0, %v1930_v33  ;;  %1680 = vmatprep.mubr.msk.bf16.mxu1 %vm374_vm0, %v1931_v34 }
  0x4b   : > { %1752 = vmatprep.mubr.msk.bf16.mxu0 %vm374_vm0, %v1932_v35 }
  0x51   : > { %1681 = vmatmul.mubr.msk.bf16.gmra.mrb[20].mxu1 %vm374_vm0, %v1933_v36 }
  0x52   : > { %1753 = vmatmul.mubr.msk.bf16.gmra.mrb[4].mxu0 %vm374_vm0, %v1934_v37  ;;  %1684 = vmatprep.mubr.msk.bf16.mxu1 %vm374_vm0, %v1935_v38 }
  0x53   : > { %1756 = vmatprep.mubr.msk.bf16.mxu0 %vm374_vm0, %v1936_v39 }
  0x59   : > { %1685 = vmatmul.mubr.msk.bf16.gmra.mrb[24].mxu1 %vm374_vm0, %v1937_v40 }
  0x5a   : > { %1757 = vmatmul.mubr.msk.bf16.gmra.mrb[8].mxu0 %vm374_vm0, %v1938_v41  ;;  %1688 = vmatprep.mubr.msk.bf16.mxu1 %vm374_vm0, %v1939_v42 }
  0x5b   : > { %1760 = vmatprep.mubr.msk.bf16.mxu0 %vm374_vm0, %v1940_v43 }
  0x61   : > { %1689 = vmatmul.mubr.msk.bf16.gmra.mrb[28].mxu1 %vm374_vm0, %v1941_v44 }
  0x62   : > { %1761 = vmatmul.mubr.msk.bf16.gmra.mrb[12].mxu0 %vm374_vm0, %v1942_v45  ;;  %1720 = vmatprep.mubr.msk.bf16.mxu1 %vm374_vm0, %v1925_v28 }
  0x63   : > { %1764 = vmatprep.mubr.msk.bf16.mxu0 %vm374_vm0, %v1943_v46 }
  0x69   : > { %1721 = vmatmul.mubr.msk.bf16.vlgmr.msra.gmra.mrb[16].mxu1 %vm374_vm0, %v1927_v29 }
  0x6a   : > { %1765 = vmatmul.mubr.msk.bf16.gmra.mrb[16].mxu0 %vm374_vm0, %v1944_v47  ;;  %1724 = vmatprep.mubr.msk.bf16.mxu1 %vm374_vm0, %v1929_v32 }
  0x6b   : > { %1768 = vmatprep.mubr.msk.bf16.mxu0 %vm374_vm0, %v1945_v48 }
  0x71   : > { %1725 = vmatmul.mubr.msk.bf16.gmra.mrb[20].mxu1 %vm374_vm0, %v1931_v34 }
  0x72   : > { %1769 = vmatmul.mubr.msk.bf16.gmra.mrb[20].mxu0 %vm374_vm0, %v1946_v49  ;;  %1728 = vmatprep.mubr.msk.bf16.mxu1 %vm374_vm0, %v1933_v36 }
  0x73   : > { %1772 = vmatprep.mubr.msk.bf16.mxu0 %vm374_vm0, %v1947_v50 }
  0x79   : > { %1729 = vmatmul.mubr.msk.bf16.gmra.mrb[24].mxu1 %vm374_vm0, %v1935_v38 }
  0x7a   : > { %1773 = vmatmul.mubr.msk.bf16.gmra.mrb[24].mxu0 %vm374_vm0, %v1948_v51  ;;  %1732 = vmatprep.mubr.msk.bf16.mxu1 %vm374_vm0, %v1937_v40 }
  0x7b   : > { %1776 = vmatprep.mubr.msk.bf16.mxu0 %vm374_vm0, %v1949_v52 }
  0x81   : > { %1733 = vmatmul.mubr.msk.bf16.gmra.mrb[28].mxu1 %vm374_vm0, %v1939_v42 }
  0x82   : > { %1777 = vmatmul.mubr.msk.bf16.gmra.mrb[28].mxu0 %vm374_vm0, %v1950_v53 }
  0x97   : > { %v2265_v12 = vpop.permute.xlu0 %1269 }
  0xfc   : > { %v1662_v54 = vpop.f32.mrb[0].mxu1 }
  0xfd   : > { %v457_v55 = vpop.f32.mrb[1].mxu1 }
  0xfe   : > { %v1663_v56 = vpop.f32.mrb[2].mxu1 }
  0xff   : > { %v460_v57 = vpop.f32.mrb[3].mxu1 }
 0x104   : > { %v1666_v58 = vpop.f32.mrb[4].mxu1 }
 0x105   : > { %v473_v59 = vpop.f32.mrb[5].mxu1 }
 0x106   : > { %v1667_v60 = vpop.f32.mrb[6].mxu1 }
 0x107   : > { %v476_v61 = vpop.f32.mrb[7].mxu1 }
 0x10c   : > { %v2243_v62 = vpop.f32.mrb[8].mxu1 }
 0x10d   : > { %v2245_v63 = vpop.f32.mrb[9].mxu1 }
 0x10e   : > { %v2247_v0 = vpop.f32.mrb[10].mxu1 }
 0x10f   : > { %v2249_v1 = vpop.f32.mrb[11].mxu1 }
 0x114   : > { %v2251_v2 = vpop.f32.mrb[12].mxu1 }
 0x115   : > { %v2253_v3 = vpop.f32.mrb[13].mxu1 }
 0x116   : > { %v2255_v4 = vpop.f32.mrb[14].mxu1 }
 0x117   : > { %v2257_v5 = vpop.f32.mrb[15].mxu1 }
 0x11d   : > { %v1750_v6 = vpop.f32.mrb[0].mxu0 }
 0x11e   : > { %v1792_v8 = vadd.f32 %v1750_v6, %v1662_v54  ;;  %v1032_v9 = vpop.f32.mrb[1].mxu0 }
 0x11f   : > { %v1793_v10 = vadd.f32 %v1032_v9, %v457_v55  ;;  %v1751_v11 = vpop.f32.mrb[2].mxu0 }
 0x120   : > { %v1200_v13 = vadd.f32 %v1792_v8, %v2263_v7  ;;  %v1794_v14 = vadd.f32 %v1751_v11, %v1663_v56  ;;  %v1035_v15 = vpop.f32.mrb[3].mxu0 }
 0x121   : > { %v1198_v16 = vadd.f32 %v1793_v10, %v2263_v7  ;;  %v1795_v17 = vadd.f32 %v1035_v15, %v460_v57 }
 0x122   : > { %vm1233_vm1 = vcmp.gt.f32.partialorder %v1200_v13, 0.0  ;;  %v1201_v18 = vadd.f32 %v1794_v14, %v2263_v7  ;;  %v1274_v19 = vmul.f32 %v2265_v12, %v1200_v13 }
 0x123   : > { %vm1231_vm3 = vcmp.gt.f32.partialorder %v1198_v16, 0.0  ;;  %v1199_v20 = vadd.f32 %v1795_v17, %v2263_v7  ;;  %v1272_v21 = vmul.f32 %v2265_v12, %v1198_v16 }
 0x124   : > { %vm1234_vm4 = vcmp.gt.f32.partialorder %v1201_v18, 0.0  ;;  %v1275_v22 = vmul.f32 %v2265_v12, %v1201_v18  ;;  %v1306_v23 = vsel %vm1233_vm1, %v1200_v13, %v1274_v19 }
 0x125   : > { %vm1232_vm5 = vcmp.gt.f32.partialorder %v1199_v20, 0.0  ;;  %v1273_v24 = vmul.f32 %v2265_v12, %v1199_v20  ;;  %v1304_v25 = vsel %vm1231_vm3, %v1198_v16, %v1272_v21  ;;  %1339 = vst.msk [vmem:[%s2277_s11 + $0x10] sm:$0xff] %vm1336_vm2, %v1306_v23  ;;  %v1754_v26 = vpop.f32.mrb[4].mxu0 }
 0x126   : > { %v1307_v27 = vsel %vm1234_vm4, %v1201_v18, %v1275_v22  ;;  %1337 = vst.msk [vmem:[%s2277_s11] sm:$0xff] %vm1336_vm2, %v1304_v25  ;;  %v1796_v28 = vadd.f32 %v1754_v26, %v1666_v58  ;;  %v1048_v29 = vpop.f32.mrb[5].mxu0 }
 0x127   : > { %v1305_v30 = vsel %vm1232_vm5, %v1199_v20, %v1273_v24  ;;  %1340 = vst.msk [vmem:[%s2277_s11 + $0x18] sm:$0xff] %vm1336_vm2, %v1307_v27  ;;  %v1797_v31 = vadd.f32 %v1048_v29, %v473_v59  ;;  %v1755_v32 = vpop.f32.mrb[6].mxu0 }
 0x128   : > { %1338 = vst.msk [vmem:[%s2277_s11 + $0x8] sm:$0xff] %vm1336_vm2, %v1305_v30  ;;  %v1204_v33 = vadd.f32 %v1796_v28, %v2263_v7  ;;  %v1798_v34 = vadd.f32 %v1755_v32, %v1667_v60  ;;  %v1051_v35 = vpop.f32.mrb[7].mxu0 }
 0x129   : > { %v1202_v36 = vadd.f32 %v1797_v31, %v2263_v7  ;;  %v1799_v37 = vadd.f32 %v1051_v35, %v476_v61 }
 0x12a   : > { %vm1237_vm6 = vcmp.gt.f32.partialorder %v1204_v33, 0.0  ;;  %v1278_v38 = vmul.f32 %v2265_v12, %v1204_v33  ;;  %v1205_v39 = vadd.f32 %v1798_v34, %v2263_v7 }
 0x12b   : > { %vm1235_vm7 = vcmp.gt.f32.partialorder %v1202_v36, 0.0  ;;  %v1276_v40 = vmul.f32 %v2265_v12, %v1202_v36  ;;  %v1203_v41 = vadd.f32 %v1799_v37, %v2263_v7 }
 0x12c   : > { %v1310_v42 = vsel %vm1237_vm6, %v1204_v33, %v1278_v38  ;;  %vm1238_vm8 = vcmp.gt.f32.partialorder %v1205_v39, 0.0  ;;  %v1279_v43 = vmul.f32 %v2265_v12, %v1205_v39 }
 0x12d   : > { %1343 = vst.msk [vmem:[%s2277_s11 + $0x30] sm:$0xff] %vm1336_vm2, %v1310_v42  ;;  %v1308_v44 = vsel %vm1235_vm7, %v1202_v36, %v1276_v40  ;;  %vm1236_vm9 = vcmp.gt.f32.partialorder %v1203_v41, 0.0  ;;  %v1277_v45 = vmul.f32 %v2265_v12, %v1203_v41  ;;  %v1758_v46 = vpop.f32.mrb[8].mxu0 }
 0x12e   : > { %1341 = vst.msk [vmem:[%s2277_s11 + $0x20] sm:$0xff] %vm1336_vm2, %v1308_v44  ;;  %v1311_v47 = vsel %vm1238_vm8, %v1205_v39, %v1279_v43  ;;  %v1800_v48 = vadd.f32 %v1758_v46, %v2243_v62  ;;  %v1064_v49 = vpop.f32.mrb[9].mxu0 }
 0x12f   : > { %1344 = vst.msk [vmem:[%s2277_s11 + $0x38] sm:$0xff] %vm1336_vm2, %v1311_v47  ;;  %v1309_v50 = vsel %vm1236_vm9, %v1203_v41, %v1277_v45  ;;  %v1801_v51 = vadd.f32 %v1064_v49, %v2245_v63  ;;  %v1759_v52 = vpop.f32.mrb[10].mxu0 }
 0x130   : > { %1342 = vst.msk [vmem:[%s2277_s11 + $0x28] sm:$0xff] %vm1336_vm2, %v1309_v50  ;;  %v1208_v53 = vadd.f32 %v1800_v48, %v2263_v7  ;;  %v1802_v54 = vadd.f32 %v1759_v52, %v2247_v0  ;;  %v1067_v55 = vpop.f32.mrb[11].mxu0 }
 0x131   : > { %v1206_v56 = vadd.f32 %v1801_v51, %v2263_v7  ;;  %v1803_v57 = vadd.f32 %v1067_v55, %v2249_v1 }
 0x132   : > { %vm1241_vm10 = vcmp.gt.f32.partialorder %v1208_v53, 0.0  ;;  %v1282_v58 = vmul.f32 %v2265_v12, %v1208_v53  ;;  %v1209_v59 = vadd.f32 %v1802_v54, %v2263_v7 }
 0x133   : > { %vm1239_vm11 = vcmp.gt.f32.partialorder %v1206_v56, 0.0  ;;  %v1280_v60 = vmul.f32 %v2265_v12, %v1206_v56  ;;  %v1207_v61 = vadd.f32 %v1803_v57, %v2263_v7 }
 0x134   : > { %v1314_v62 = vsel %vm1241_vm10, %v1208_v53, %v1282_v58  ;;  %vm1242_vm12 = vcmp.gt.f32.partialorder %v1209_v59, 0.0  ;;  %v1283_v63 = vmul.f32 %v2265_v12, %v1209_v59 }
 0x135   : > { %1347 = vst.msk [vmem:[%s2277_s11 + $0x50] sm:$0xff] %vm1336_vm2, %v1314_v62  ;;  %v1312_v0 = vsel %vm1239_vm11, %v1206_v56, %v1280_v60  ;;  %vm1240_vm13 = vcmp.gt.f32.partialorder %v1207_v61, 0.0  ;;  %v1281_v1 = vmul.f32 %v2265_v12, %v1207_v61  ;;  %v1762_v6 = vpop.f32.mrb[12].mxu0 }
 0x136   : > { %1345 = vst.msk [vmem:[%s2277_s11 + $0x40] sm:$0xff] %vm1336_vm2, %v1312_v0  ;;  %v1315_v8 = vsel %vm1242_vm12, %v1209_v59, %v1283_v63  ;;  %v1804_v9 = vadd.f32 %v1762_v6, %v2251_v2  ;;  %v1080_v10 = vpop.f32.mrb[13].mxu0 }
 0x137   : > { %1348 = vst.msk [vmem:[%s2277_s11 + $0x58] sm:$0xff] %vm1336_vm2, %v1315_v8  ;;  %v1313_v11 = vsel %vm1240_vm13, %v1207_v61, %v1281_v1  ;;  %v1805_v13 = vadd.f32 %v1080_v10, %v2253_v3  ;;  %v1763_v14 = vpop.f32.mrb[14].mxu0 }
 0x138   : > { %1346 = vst.msk [vmem:[%s2277_s11 + $0x48] sm:$0xff] %vm1336_vm2, %v1313_v11  ;;  %v1212_v15 = vadd.f32 %v1804_v9, %v2263_v7  ;;  %v1806_v16 = vadd.f32 %v1763_v14, %v2255_v4  ;;  %v1083_v17 = vpop.f32.mrb[15].mxu0 }
 0x139   : > { %v1210_v18 = vadd.f32 %v1805_v13, %v2263_v7  ;;  %v1807_v19 = vadd.f32 %v1083_v17, %v2257_v5 }
 0x13a   : > { %vm1245_vm14 = vcmp.gt.f32.partialorder %v1212_v15, 0.0  ;;  %v1286_v2 = vmul.f32 %v2265_v12, %v1212_v15  ;;  %v1213_v20 = vadd.f32 %v1806_v16, %v2263_v7 }
 0x13b   : > { %vm1243_vm15 = vcmp.gt.f32.partialorder %v1210_v18, 0.0  ;;  %v1284_v3 = vmul.f32 %v2265_v12, %v1210_v18  ;;  %v1211_v21 = vadd.f32 %v1807_v19, %v2263_v7 }
 0x13c   : > { %v1318_v22 = vsel %vm1245_vm14, %v1212_v15, %v1286_v2  ;;  %vm1246_vm0 = vcmp.gt.f32.partialorder %v1213_v20, 0.0  ;;  %v1287_v4 = vmul.f32 %v2265_v12, %v1213_v20  ;;  %v1722_v23 = vpop.f32.mrb[16].mxu1 }
 0x13d   : > { %1351 = vst.msk [vmem:[%s2277_s11 + $0x70] sm:$0xff] %vm1336_vm2, %v1318_v22  ;;  %v1316_v5 = vsel %vm1243_vm15, %v1210_v18, %v1284_v3  ;;  %vm1244_vm1 = vcmp.gt.f32.partialorder %v1211_v21, 0.0  ;;  %v1285_v24 = vmul.f32 %v2265_v12, %v1211_v21  ;;  %v1766_v25 = vpop.f32.mrb[16].mxu0  ;;  %v726_v26 = vpop.f32.mrb[17].mxu1 }
 0x13e   : > { %1349 = vst.msk [vmem:[%s2277_s11 + $0x60] sm:$0xff] %vm1336_vm2, %v1316_v5  ;;  %v1319_v27 = vsel %vm1246_vm0, %v1213_v20, %v1287_v4  ;;  %v1808_v28 = vadd.f32 %v1766_v25, %v1722_v23  ;;  %v1096_v29 = vpop.f32.mrb[17].mxu0  ;;  %v1723_v30 = vpop.f32.mrb[18].mxu1 }
 0x13f   : > { %1352 = vst.msk [vmem:[%s2277_s11 + $0x78] sm:$0xff] %vm1336_vm2, %v1319_v27  ;;  %v1317_v31 = vsel %vm1244_vm1, %v1211_v21, %v1285_v24  ;;  %v1809_v32 = vadd.f32 %v1096_v29, %v726_v26  ;;  %v1767_v33 = vpop.f32.mrb[18].mxu0  ;;  %v729_v34 = vpop.f32.mrb[19].mxu1 }
 0x140   : > { %1350 = vst.msk [vmem:[%s2277_s11 + $0x68] sm:$0xff] %vm1336_vm2, %v1317_v31  ;;  %v1216_v35 = vadd.f32 %v1808_v28, %v2263_v7  ;;  %v1810_v36 = vadd.f32 %v1767_v33, %v1723_v30  ;;  %v1099_v37 = vpop.f32.mrb[19].mxu0 }
 0x141   : > { %v1214_v38 = vadd.f32 %v1809_v32, %v2263_v7  ;;  %v1811_v39 = vadd.f32 %v1099_v37, %v729_v34 }
 0x142   : > { %vm1249_vm3 = vcmp.gt.f32.partialorder %v1216_v35, 0.0  ;;  %v1290_v40 = vmul.f32 %v2265_v12, %v1216_v35  ;;  %v1217_v41 = vadd.f32 %v1810_v36, %v2263_v7 }
 0x143   : > { %vm1247_vm4 = vcmp.gt.f32.partialorder %v1214_v38, 0.0  ;;  %v1288_v42 = vmul.f32 %v2265_v12, %v1214_v38  ;;  %v1215_v43 = vadd.f32 %v1811_v39, %v2263_v7 }
 0x144   : > { %v1322_v44 = vsel %vm1249_vm3, %v1216_v35, %v1290_v40  ;;  %vm1250_vm5 = vcmp.gt.f32.partialorder %v1217_v41, 0.0  ;;  %v1291_v45 = vmul.f32 %v2265_v12, %v1217_v41  ;;  %v1726_v46 = vpop.f32.mrb[20].mxu1 }
 0x145   : > { %1355 = vst.msk [vmem:[%s2277_s11 + $0x90] sm:$0xff] %vm1336_vm2, %v1322_v44  ;;  %v1320_v47 = vsel %vm1247_vm4, %v1214_v38, %v1288_v42  ;;  %vm1248_vm6 = vcmp.gt.f32.partialorder %v1215_v43, 0.0  ;;  %v1289_v48 = vmul.f32 %v2265_v12, %v1215_v43  ;;  %v1770_v49 = vpop.f32.mrb[20].mxu0  ;;  %v742_v50 = vpop.f32.mrb[21].mxu1 }
 0x146   : > { %1353 = vst.msk [vmem:[%s2277_s11 + $0x80] sm:$0xff] %vm1336_vm2, %v1320_v47  ;;  %v1323_v51 = vsel %vm1250_vm5, %v1217_v41, %v1291_v45  ;;  %v1812_v52 = vadd.f32 %v1770_v49, %v1726_v46  ;;  %v1112_v53 = vpop.f32.mrb[21].mxu0  ;;  %v1727_v54 = vpop.f32.mrb[22].mxu1 }
 0x147   : > { %1356 = vst.msk [vmem:[%s2277_s11 + $0x98] sm:$0xff] %vm1336_vm2, %v1323_v51  ;;  %v1321_v55 = vsel %vm1248_vm6, %v1215_v43, %v1289_v48  ;;  %v1813_v56 = vadd.f32 %v1112_v53, %v742_v50  ;;  %v1771_v57 = vpop.f32.mrb[22].mxu0  ;;  %v745_v58 = vpop.f32.mrb[23].mxu1 }
 0x148   : > { %1354 = vst.msk [vmem:[%s2277_s11 + $0x88] sm:$0xff] %vm1336_vm2, %v1321_v55  ;;  %v1220_v59 = vadd.f32 %v1812_v52, %v2263_v7  ;;  %v1814_v60 = vadd.f32 %v1771_v57, %v1727_v54  ;;  %v1115_v61 = vpop.f32.mrb[23].mxu0 }
 0x149   : > { %v1218_v62 = vadd.f32 %v1813_v56, %v2263_v7  ;;  %v1815_v63 = vadd.f32 %v1115_v61, %v745_v58 }
 0x14a   : > { %vm1253_vm7 = vcmp.gt.f32.partialorder %v1220_v59, 0.0  ;;  %v1294_v0 = vmul.f32 %v2265_v12, %v1220_v59  ;;  %v1221_v1 = vadd.f32 %v1814_v60, %v2263_v7 }
 0x14b   : > { %vm1251_vm8 = vcmp.gt.f32.partialorder %v1218_v62, 0.0  ;;  %v1292_v6 = vmul.f32 %v2265_v12, %v1218_v62  ;;  %v1219_v8 = vadd.f32 %v1815_v63, %v2263_v7 }
 0x14c   : > { %v1326_v9 = vsel %vm1253_vm7, %v1220_v59, %v1294_v0  ;;  %vm1254_vm9 = vcmp.gt.f32.partialorder %v1221_v1, 0.0  ;;  %v1295_v10 = vmul.f32 %v2265_v12, %v1221_v1  ;;  %v1730_v11 = vpop.f32.mrb[24].mxu1 }
 0x14d   : > { %1359 = vst.msk [vmem:[%s2277_s11 + $0xb0] sm:$0xff] %vm1336_vm2, %v1326_v9  ;;  %v1324_v13 = vsel %vm1251_vm8, %v1218_v62, %v1292_v6  ;;  %vm1252_vm10 = vcmp.gt.f32.partialorder %v1219_v8, 0.0  ;;  %v1293_v14 = vmul.f32 %v2265_v12, %v1219_v8  ;;  %v1774_v15 = vpop.f32.mrb[24].mxu0  ;;  %v758_v16 = vpop.f32.mrb[25].mxu1 }
 0x14e   : > { %1357 = vst.msk [vmem:[%s2277_s11 + $0xa0] sm:$0xff] %vm1336_vm2, %v1324_v13  ;;  %v1327_v17 = vsel %vm1254_vm9, %v1221_v1, %v1295_v10  ;;  %v1816_v18 = vadd.f32 %v1774_v15, %v1730_v11  ;;  %v1128_v19 = vpop.f32.mrb[25].mxu0  ;;  %v1731_v2 = vpop.f32.mrb[26].mxu1 }
 0x14f   : > { %1360 = vst.msk [vmem:[%s2277_s11 + $0xb8] sm:$0xff] %vm1336_vm2, %v1327_v17  ;;  %v1325_v20 = vsel %vm1252_vm10, %v1219_v8, %v1293_v14  ;;  %v1817_v3 = vadd.f32 %v1128_v19, %v758_v16  ;;  %v1775_v21 = vpop.f32.mrb[26].mxu0  ;;  %v761_v22 = vpop.f32.mrb[27].mxu1 }
 0x150   : > { %1358 = vst.msk [vmem:[%s2277_s11 + $0xa8] sm:$0xff] %vm1336_vm2, %v1325_v20  ;;  %v1224_v4 = vadd.f32 %v1816_v18, %v2263_v7  ;;  %v1818_v23 = vadd.f32 %v1775_v21, %v1731_v2  ;;  %v1131_v5 = vpop.f32.mrb[27].mxu0 }
 0x151   : > { %v1222_v24 = vadd.f32 %v1817_v3, %v2263_v7  ;;  %v1819_v25 = vadd.f32 %v1131_v5, %v761_v22 }
 0x152   : > { %vm1257_vm11 = vcmp.gt.f32.partialorder %v1224_v4, 0.0  ;;  %v1298_v26 = vmul.f32 %v2265_v12, %v1224_v4  ;;  %v1225_v27 = vadd.f32 %v1818_v23, %v2263_v7 }
 0x153   : > { %vm1255_vm12 = vcmp.gt.f32.partialorder %v1222_v24, 0.0  ;;  %v1296_v28 = vmul.f32 %v2265_v12, %v1222_v24  ;;  %v1223_v29 = vadd.f32 %v1819_v25, %v2263_v7 }
 0x154   : > { %v1330_v30 = vsel %vm1257_vm11, %v1224_v4, %v1298_v26  ;;  %vm1258_vm13 = vcmp.gt.f32.partialorder %v1225_v27, 0.0  ;;  %v1299_v31 = vmul.f32 %v2265_v12, %v1225_v27  ;;  %v1734_v32 = vpop.f32.mrb[28].mxu1 }
 0x155   : > { %1363 = vst.msk [vmem:[%s2277_s11 + $0xd0] sm:$0xff] %vm1336_vm2, %v1330_v30  ;;  %v1328_v33 = vsel %vm1255_vm12, %v1222_v24, %v1296_v28  ;;  %vm1256_vm14 = vcmp.gt.f32.partialorder %v1223_v29, 0.0  ;;  %v1297_v34 = vmul.f32 %v2265_v12, %v1223_v29  ;;  %v1778_v35 = vpop.f32.mrb[28].mxu0  ;;  %v774_v36 = vpop.f32.mrb[29].mxu1 }
 0x156   : > { %1361 = vst.msk [vmem:[%s2277_s11 + $0xc0] sm:$0xff] %vm1336_vm2, %v1328_v33  ;;  %v1331_v37 = vsel %vm1258_vm13, %v1225_v27, %v1299_v31  ;;  %v1820_v38 = vadd.f32 %v1778_v35, %v1734_v32  ;;  %v1144_v39 = vpop.f32.mrb[29].mxu0  ;;  %v1735_v40 = vpop.f32.mrb[30].mxu1 }
 0x157   : > { %1364 = vst.msk [vmem:[%s2277_s11 + $0xd8] sm:$0xff] %vm1336_vm2, %v1331_v37  ;;  %v1329_v41 = vsel %vm1256_vm14, %v1223_v29, %v1297_v34  ;;  %v1821_v42 = vadd.f32 %v1144_v39, %v774_v36  ;;  %v1779_v43 = vpop.f32.mrb[30].mxu0  ;;  %v777_v44 = vpop.f32.mrb[31].mxu1 }
 0x158   : > { %1362 = vst.msk [vmem:[%s2277_s11 + $0xc8] sm:$0xff] %vm1336_vm2, %v1329_v41  ;;  %v1228_v45 = vadd.f32 %v1820_v38, %v2263_v7  ;;  %v1822_v46 = vadd.f32 %v1779_v43, %v1735_v40  ;;  %v1147_v47 = vpop.f32.mrb[31].mxu0 }
 0x159   : > { %v1226_v48 = vadd.f32 %v1821_v42, %v2263_v7  ;;  %v1823_v49 = vadd.f32 %v1147_v47, %v777_v44 }
 0x15a   : > { %vm1261_vm15 = vcmp.gt.f32.partialorder %v1228_v45, 0.0  ;;  %v1302_v50 = vmul.f32 %v2265_v12, %v1228_v45  ;;  %v1229_v51 = vadd.f32 %v1822_v46, %v2263_v7 }
 0x15b   : > { %vm1259_vm0 = vcmp.gt.f32.partialorder %v1226_v48, 0.0  ;;  %v1300_v52 = vmul.f32 %v2265_v12, %v1226_v48  ;;  %v1227_v53 = vadd.f32 %v1823_v49, %v2263_v7 }
 0x15c   : > { %v1334_v54 = vsel %vm1261_vm15, %v1228_v45, %v1302_v50  ;;  %vm1262_vm1 = vcmp.gt.f32.partialorder %v1229_v51, 0.0  ;;  %v1303_v55 = vmul.f32 %v2265_v12, %v1229_v51 }
 0x15d   : > { %1367 = vst.msk [vmem:[%s2277_s11 + $0xf0] sm:$0xff] %vm1336_vm2, %v1334_v54  ;;  %v1332_v56 = vsel %vm1259_vm0, %v1226_v48, %v1300_v52  ;;  %vm1260_vm3 = vcmp.gt.f32.partialorder %v1227_v53, 0.0  ;;  %v1301_v57 = vmul.f32 %v2265_v12, %v1227_v53 }
 0x15e   : > { %1365 = vst.msk [vmem:[%s2277_s11 + $0xe0] sm:$0xff] %vm1336_vm2, %v1332_v56  ;;  %v1335_v7 = vsel %vm1262_vm1, %v1229_v51, %v1303_v55 }
 0x15f   : > { %1368 = vst.msk [vmem:[%s2277_s11 + $0xf8] sm:$0xff] %vm1336_vm2, %v1335_v7  ;;  %v1333_v58 = vsel %vm1260_vm3, %v1227_v53, %v1301_v57 }
 0x160   : > { %1366 = vst.msk [vmem:[%s2277_s11 + $0xe8] sm:$0xff] %vm1336_vm2, %v1333_v58 }
 0x161   : > { %1964 = shalt.err (!%p1961_p3)
}
 0x162   : > { %s1965_s29 = scalar_lea.hbm %s2406_s15, 4096  ;;  %s1969_s7 = scalar_lea.hbm %s2463_s4, 8192 }
 0x163   : > { %p1966_p4 = scmp.ne.s32.totalorder %s2406_s15, %s1965_s29  ;;  %p1970_p9 = scmp.lt.u32.totalorder %s2406_s15, %s2463_s4 }
 0x164   : > { %p1971_p10 = scmp.lt.u32.totalorder %s1969_s7, %s1965_s29  ;;  %p1973_p12 = scmp.lt.u32.totalorder %s1965_s29, %s2406_s15 }
 0x165   : > { %p1967_p7 = pnand %p1966_p4, %p2085_p5 }
 0x166   : > { %p1972_p11 = por %p1971_p10, %p1970_p9 }
 0x167   : > { %p1968_p8 = pneg %p1967_p7 }
 0x168   : > { %p1974_p13 = por %p1973_p12, %p1972_p11 }
 0x16a   : > { %p1975_p0 = pnand %p1974_p13, %p1968_p8 }
 0x16c   : > { %1978 = shalt.err (!%p1975_p0)
}
 0x16d   : > { %s2017_s9 = smov 128   ;;  %s2018_s10 = smov 8  }
 0x16e   : > { %1857 = dma.vmem_to_hbm [thread:$0]  (%p2085_p5), %s2408_s13, 4096, %s2406_s15, %s2418_s16, %s2017_s9, %s2017_s9, %s2018_s10  }
 0x16f PF: > { %p1863_p1 = scmp.ge.s32.totalorder %s2013_s20, 2  ;;  %s1398_s11 = sand.u32 1, %s2001_s17  }
 0x170   : > { %s1399_s12 = scalar_lea.sflag [#allocation4], %s1398_s11 }
 0x171   : > { %p1860_p2 = pnand %p1863_p1, %p2089_p6 }
 0x173   : > { %1996 = dma.done.wait (!%p1860_p2), %s1399_s12, 4096  }
 0x174   : > { %1998 = vsyncadd (!%p1860_p2), %s1399_s12, 4294963200  ;;  %p16_p3 = scmp.ge.s32.totalorder %s2072_s22, 4   ;;  %s2466_s17 = smov %s2005_s18 }
 0x175   : > { %s2467_s18 = smov %s2009_s19  ;;  %s2468_s19 = smov %s2083_s25 }
 0x176   : > { %s2469_s20 = smov %s2072_s22  ;;  %18 = sbr.rel (!%p16_p3) target bundleno = 6 (0x6), region = 73 }
 0x17d   :  { %1404 = vsyncpa [#allocation4], 1 }
 0x17e   :  { %1406 = vsyncpa [#allocation4 + $0x1], 1 }

// kernel: encoder_block_forward.2
= control target key start
LH: loop header
LB: loop body
LE: loop exit
PB: predicated region body
PF: predicated region fallthrough
CT: control target
= control target key end

     0   :  { %s1913_s17 = smov 0   ;;  %s2194_s0 = inlined_call_operand.vmem [shape: bf16[2,288,12], index: 0, kind: input, shape index: {}]   ;;  %s2195_s1 = inlined_call_operand.vmem [shape: bf16[3,12,32], index: 1, kind: input, shape index: {}]   ;;  %s2196_s2 = inlined_call_operand.vmem [shape: f32[1,32], index: 2, kind: input, shape index: {}]   ;;  %s2197_s3 = inlined_call_operand.<no memory space> [shape: f32[1,1], index: 3, kind: input, shape index: {}]   ;;  %s2198_s4 = inlined_call_operand.vmem [shape: bf16[2,256,32], index: 4, kind: output, shape index: {}]  }
   0x1   :  { %v9_v0 = vstv %s2197_s3 }
   0x2   :  { %10 = vst [vmem:[#allocation2] sm:$0x1] %v9_v0 }
   0x3 LB: > { %s1441_s18 = sadd.s32 4294967295, %s1882_s17   ;;  %p1445_p0 = scmp.ge.s32.totalorder %s1882_s17, 1  ;;  %s1882_s17 = sphi %s1913_s17, %s16_s17  }
   0x4   : > { %p164_p1 = scmp.lt.s32.totalorder %s1882_s17, 3 }
   0x6   : > { %p165_p2 = pnand %p1445_p0, %p164_p1 }
   0x7   : > { %v1840_v1 = vld [vmem:[%s2195_s1 + $0x8] sm:$0x3f] (!%p165_p2)   ;;  %vm374_vm0 = vcmask (!%p165_p2), 1045504   ;;  %p190_p3 = scmp.lt.s32.totalorder (!%p165_p2), %s1441_s18, 1  ;;  %v1841_v2 = vld [vmem:[%s2195_s1] sm:$0x3f] (!%p165_p2)  }
   0x8   : > { %168 = sbr.rel (%p165_p2) target bundleno = 334 (0x14e), region = 36  ;;  %1825 = vmatprep.subr.msk.bf16.mxu1 (!%p165_p2), %vm374_vm0, %v1840_v1  ;;  %v376_v3 = vsel (!%p165_p2), %vm374_vm0, %v1840_v1, 0  ;;  %v1844_v4 = vld [vmem:[%s2195_s1 + $0x10] sm:$0x3f] (!%p165_p2)   ;;  %1826 = vmatprep.subr.msk.bf16.mxu0 (!%p165_p2), %vm374_vm0, %v1841_v2  ;;  %v553_v5 = vsel (!%p165_p2), %vm374_vm0, %v1841_v2, 0  ;;  %v1884_v7 = vmov (!%p165_p2), 0  }
   0x9   : > { %1658 = vmatpush3.bf16.msra.mxu1 (!%p165_p2), %v376_v3  ;;  %v1538_v6 = vld [vmem:[#allocation2] ss:$0 sm:$0xff] (!%p165_p2)  ;;  %1692 = vmatpush3.bf16.msra.mxu0 (!%p165_p2), %v553_v5  ;;  %vm325_vm1 = vcmask (!%p165_p2), 97280   ;;  %v885_v11 = vsel (!%p165_p2), %vm374_vm0, %v1844_v4, 0  ;;  %vm1353_vm5 = vcmask (!%p165_p2), 257024  }
   0xa   : > { %1827 = vmatprep.subr.msk.bf16.mxu1 (!%p165_p2), %vm374_vm0, %v1841_v2  ;;  %1839 = vset.pattern.permute.xlu0 (!%p165_p2), %v1884_v7  ;;  %v2045_v59 = vld [vmem:[%s2196_s2] ss:$0 sm:$0xff] (!%p165_p2) }
   0xb   : > { %1828 = vmatprep.subr.msk.bf16.mxu0 (!%p165_p2), %vm374_vm0, %v1844_v4  ;;  %1158 = vperm.xlu0 (!%p165_p2), %1839, %v1538_v6  }
   0xf   : > { %s2200_s18 = smov (!%p190_p3, %s1441_s18), 1 }
  0x10   : > { %s1829_s24 = smul.u32 144, %s2200_s18  ;;  %s1573_s30 = sshll.u32 %s2200_s18, 7 }
  0x11   : > { %s2059_s7 = scalar_lea.vmem %s2198_s4, %s1573_s30 }
  0x12   : > { %s1942_s27 = scalar_lea.vmem %s2194_s0, %s1829_s24 }
  0x13   : > { %v1842_v8 = vld [vmem:[%s1942_s27 + $0x8] sm:$0xff]   ;;  %v1843_v9 = vld [vmem:[%s1942_s27] sm:$0xff]   ;;  %v1845_v10 = vld [vmem:[%s1942_s27 + $0x10] sm:$0xff]  }
  0x14   : > { %1659 = vmatprep.mubr.msk.bf16.mxu1 %vm325_vm1, %v1842_v8  ;;  %1693 = vmatprep.mubr.msk.bf16.mxu0 %vm325_vm1, %v1843_v9  ;;  %v1846_v12 = vld [vmem:[%s1942_s27 + $0x18] sm:$0xff]   ;;  %v1847_v13 = vld [vmem:[%s1942_s27 + $0x20] sm:$0xff]   ;;  %v1848_v14 = vld [vmem:[%s1942_s27 + $0x28] sm:$0xff]  }
  0x15   : > { %1660 = vmatmul.mubr.msk.bf16.vlgmr.msra.gmra.mrb[0].mxu1 %vm325_vm1, %v1845_v10  ;;  %1694 = vmatmul.mubr.msk.bf16.vlgmr.msra.gmra.mrb[0].mxu0 %vm325_vm1, %v1842_v8  ;;  %v1849_v15 = vld [vmem:[%s1942_s27 + $0x30] sm:$0xff]   ;;  %v1850_v16 = vld [vmem:[%s1942_s27 + $0x38] sm:$0xff]   ;;  %v1851_v17 = vld [vmem:[%s1942_s27 + $0x40] sm:$0xff]  }
  0x16   : > { %1760 = vmatpush3.bf16.msra.mxu1 %v553_v5  ;;  %1726 = vmatpush3.bf16.msra.mxu0 %v885_v11  ;;  %v1852_v18 = vld [vmem:[%s1942_s27 + $0x48] sm:$0xff]   ;;  %v1853_v19 = vld [vmem:[%s1942_s27 + $0x10] sm:$0xff]   ;;  %v1855_v21 = vld [vmem:[%s1942_s27 + $0x18] sm:$0xff]  }
  0x17   : > { %1663 = vmatprep.mubr.msk.bf16.mxu1 %vm325_vm1, %v1846_v12  ;;  %1697 = vmatprep.mubr.msk.bf16.mxu0 %vm325_vm1, %v1845_v10  ;;  %v1854_v20 = vld [vmem:[%s1942_s27 + $0x50] sm:$0xff]   ;;  %v1856_v22 = vld [vmem:[%s1942_s27 + $0x58] sm:$0xff]   ;;  %v1857_v23 = vld [vmem:[%s1942_s27 + $0x20] sm:$0xff]  }
  0x18   : > { %v1858_v24 = vld [vmem:[%s1942_s27 + $0x60] sm:$0xff]   ;;  %v1859_v25 = vld [vmem:[%s1942_s27 + $0x28] sm:$0xff]   ;;  %v1861_v27 = vld [vmem:[%s1942_s27 + $0x30] sm:$0xff]  }
  0x19   : > { %v1860_v26 = vld [vmem:[%s1942_s27 + $0x68] sm:$0xff]   ;;  %v1862_v28 = vld [vmem:[%s1942_s27 + $0x70] sm:$0xff]   ;;  %v1863_v29 = vld [vmem:[%s1942_s27 + $0x38] sm:$0xff]  }
  0x1a   : > { %v1864_v30 = vld [vmem:[%s1942_s27 + $0x78] sm:$0xff]   ;;  %v1865_v31 = vld [vmem:[%s1942_s27 + $0x40] sm:$0xff]   ;;  %v1867_v33 = vld [vmem:[%s1942_s27 + $0x48] sm:$0xff]  }
  0x1b   : > { %v1866_v32 = vld [vmem:[%s1942_s27 + $0x80] sm:$0xff]   ;;  %v1868_v34 = vld [vmem:[%s1942_s27 + $0x50] sm:$0xff]   ;;  %v1869_v35 = vld [vmem:[%s1942_s27 + $0x58] sm:$0xff]  }
  0x1c   : > { %v1870_v36 = vld [vmem:[%s1942_s27 + $0x60] sm:$0xff]   ;;  %v1871_v37 = vld [vmem:[%s1942_s27 + $0x68] sm:$0xff]   ;;  %v1872_v38 = vld [vmem:[%s1942_s27 + $0x70] sm:$0xff]  }
  0x1d   : > { %1664 = vmatmul.mubr.msk.bf16.gmra.mrb[4].mxu1 %vm325_vm1, %v1847_v13  ;;  %1698 = vmatmul.mubr.msk.bf16.gmra.mrb[4].mxu0 %vm325_vm1, %v1846_v12  ;;  %v1873_v39 = vld [vmem:[%s1942_s27 + $0x78] sm:$0xff]   ;;  %v1874_v40 = vld [vmem:[%s1942_s27 + $0x80] sm:$0xff]   ;;  %v1875_v41 = vld [vmem:[%s1942_s27 + $0x88] sm:$0xff]  }
  0x1e   : > { %1667 = vmatprep.mubr.msk.bf16.mxu1 %vm325_vm1, %v1848_v14  ;;  %1701 = vmatprep.mubr.msk.bf16.mxu0 %vm325_vm1, %v1847_v13 }
  0x25   : > { %1668 = vmatmul.mubr.msk.bf16.gmra.mrb[8].mxu1 %vm325_vm1, %v1849_v15  ;;  %1702 = vmatmul.mubr.msk.bf16.gmra.mrb[8].mxu0 %vm325_vm1, %v1848_v14 }
  0x26   : > { %1671 = vmatprep.mubr.msk.bf16.mxu1 %vm325_vm1, %v1850_v16  ;;  %1705 = vmatprep.mubr.msk.bf16.mxu0 %vm325_vm1, %v1849_v15 }
  0x2d   : > { %1672 = vmatmul.mubr.msk.bf16.gmra.mrb[12].mxu1 %vm325_vm1, %v1851_v17  ;;  %1706 = vmatmul.mubr.msk.bf16.gmra.mrb[12].mxu0 %vm325_vm1, %v1850_v16 }
  0x2e   : > { %1675 = vmatprep.mubr.msk.bf16.mxu1 %vm325_vm1, %v1852_v18  ;;  %1727 = vmatprep.mubr.msk.bf16.mxu0 %vm325_vm1, %v1853_v19 }
  0x35   : > { %1676 = vmatmul.mubr.msk.bf16.gmra.mrb[16].mxu1 %vm325_vm1, %v1854_v20  ;;  %1728 = vmatmul.mubr.msk.bf16.vlgmr.msra.gmra.mrb[0].mxu0 %vm325_vm1, %v1855_v21 }
  0x36   : > { %1679 = vmatprep.mubr.msk.bf16.mxu1 %vm325_vm1, %v1856_v22  ;;  %1731 = vmatprep.mubr.msk.bf16.mxu0 %vm325_vm1, %v1857_v23 }
  0x3d   : > { %1680 = vmatmul.mubr.msk.bf16.gmra.mrb[20].mxu1 %vm325_vm1, %v1858_v24  ;;  %1732 = vmatmul.mubr.msk.bf16.gmra.mrb[4].mxu0 %vm325_vm1, %v1859_v25 }
  0x3e   : > { %1683 = vmatprep.mubr.msk.bf16.mxu1 %vm325_vm1, %v1860_v26  ;;  %1735 = vmatprep.mubr.msk.bf16.mxu0 %vm325_vm1, %v1861_v27 }
  0x45   : > { %1684 = vmatmul.mubr.msk.bf16.gmra.mrb[24].mxu1 %vm325_vm1, %v1862_v28  ;;  %1736 = vmatmul.mubr.msk.bf16.gmra.mrb[8].mxu0 %vm325_vm1, %v1863_v29 }
  0x46   : > { %1687 = vmatprep.mubr.msk.bf16.mxu1 %vm325_vm1, %v1864_v30  ;;  %1739 = vmatprep.mubr.msk.bf16.mxu0 %vm325_vm1, %v1865_v31 }
  0x4d   : > { %1688 = vmatmul.mubr.msk.bf16.gmra.mrb[28].mxu1 %vm325_vm1, %v1866_v32  ;;  %1740 = vmatmul.mubr.msk.bf16.gmra.mrb[12].mxu0 %vm325_vm1, %v1867_v33 }
  0x4e   : > { %1709 = vmatprep.mubr.msk.bf16.mxu1 %vm325_vm1, %v1851_v17  ;;  %1743 = vmatprep.mubr.msk.bf16.mxu0 %vm325_vm1, %v1868_v34 }
  0x55   : > { %1710 = vmatmul.mubr.msk.bf16.vlgmr.msra.gmra.mrb[16].mxu1 %vm325_vm1, %v1852_v18  ;;  %1744 = vmatmul.mubr.msk.bf16.gmra.mrb[16].mxu0 %vm325_vm1, %v1869_v35 }
  0x56   : > { %1713 = vmatprep.mubr.msk.bf16.mxu1 %vm325_vm1, %v1854_v20  ;;  %1747 = vmatprep.mubr.msk.bf16.mxu0 %vm325_vm1, %v1870_v36 }
  0x5d   : > { %1714 = vmatmul.mubr.msk.bf16.gmra.mrb[20].mxu1 %vm325_vm1, %v1856_v22  ;;  %1748 = vmatmul.mubr.msk.bf16.gmra.mrb[20].mxu0 %vm325_vm1, %v1871_v37 }
  0x5e   : > { %1717 = vmatprep.mubr.msk.bf16.mxu1 %vm325_vm1, %v1858_v24  ;;  %1751 = vmatprep.mubr.msk.bf16.mxu0 %vm325_vm1, %v1872_v38 }
  0x65   : > { %1718 = vmatmul.mubr.msk.bf16.gmra.mrb[24].mxu1 %vm325_vm1, %v1860_v26  ;;  %1752 = vmatmul.mubr.msk.bf16.gmra.mrb[24].mxu0 %vm325_vm1, %v1873_v39 }
  0x66   : > { %1721 = vmatprep.mubr.msk.bf16.mxu1 %vm325_vm1, %v1862_v28  ;;  %1755 = vmatprep.mubr.msk.bf16.mxu0 %vm325_vm1, %v1874_v40 }
  0x6d   : > { %1722 = vmatmul.mubr.msk.bf16.gmra.mrb[28].mxu1 %vm325_vm1, %v1864_v30  ;;  %1756 = vmatmul.mubr.msk.bf16.gmra.mrb[28].mxu0 %vm325_vm1, %v1875_v41 }
  0x8a   : > { %v2047_v0 = vpop.permute.xlu0 %1158 }
  0xe8   : > { %v1661_v42 = vpop.f32.mrb[0].mxu1 }
  0xe9   : > { %v412_v43 = vpop.f32.mrb[1].mxu1 }
  0xea   : > { %v1662_v44 = vpop.f32.mrb[2].mxu1 }
  0xeb   : > { %v415_v45 = vpop.f32.mrb[3].mxu1 }
  0xf0   : > { %v1665_v46 = vpop.f32.mrb[4].mxu1 }
  0xf1   : > { %v428_v47 = vpop.f32.mrb[5].mxu1 }
  0xf2   : > { %v1666_v48 = vpop.f32.mrb[6].mxu1 }
  0xf3   : > { %v431_v49 = vpop.f32.mrb[7].mxu1 }
  0xf8   : > { %v2026_v50 = vpop.f32.mrb[8].mxu1 }
  0xf9   : > { %v2028_v51 = vpop.f32.mrb[9].mxu1 }
  0xfa   : > { %v2030_v52 = vpop.f32.mrb[10].mxu1 }
  0xfb   : > { %v2032_v53 = vpop.f32.mrb[11].mxu1 }
 0x100   : > { %v2034_v54 = vpop.f32.mrb[12].mxu1 }
 0x101   : > { %v2036_v55 = vpop.f32.mrb[13].mxu1 }
 0x102   : > { %v2038_v56 = vpop.f32.mrb[14].mxu1 }
 0x103   : > { %v2040_v57 = vpop.f32.mrb[15].mxu1 }
 0x108   : > { %v1729_v58 = vpop.f32.mrb[0].mxu0 }
 0x109   : > { %v1761_v60 = vadd.f32 %v1729_v58, %v1661_v42  ;;  %v921_v61 = vpop.f32.mrb[1].mxu0 }
 0x10a   : > { %v1762_v62 = vadd.f32 %v921_v61, %v412_v43  ;;  %v1730_v63 = vpop.f32.mrb[2].mxu0 }
 0x10b   : > { %v1089_v1 = vadd.f32 %v1761_v60, %v2045_v59  ;;  %v1763_v2 = vadd.f32 %v1730_v63, %v1662_v44  ;;  %v924_v3 = vpop.f32.mrb[3].mxu0 }
 0x10c   : > { %v1087_v4 = vadd.f32 %v1762_v62, %v2045_v59  ;;  %v1764_v5 = vadd.f32 %v924_v3, %v415_v45 }
 0x10d   : > { %vm1122_vm2 = vcmp.gt.f32.partialorder %v1089_v1, 0.0  ;;  %v1090_v6 = vadd.f32 %v1763_v2, %v2045_v59  ;;  %v1163_v7 = vmul.f32 %v2047_v0, %v1089_v1 }
 0x10e   : > { %vm1120_vm3 = vcmp.gt.f32.partialorder %v1087_v4, 0.0  ;;  %v1088_v8 = vadd.f32 %v1764_v5, %v2045_v59  ;;  %v1161_v9 = vmul.f32 %v2047_v0, %v1087_v4 }
 0x10f   : > { %vm1123_vm4 = vcmp.gt.f32.partialorder %v1090_v6, 0.0  ;;  %v1164_v10 = vmul.f32 %v2047_v0, %v1090_v6  ;;  %v1195_v11 = vsel %vm1122_vm2, %v1089_v1, %v1163_v7 }
 0x110   : > { %vm1121_vm6 = vcmp.gt.f32.partialorder %v1088_v8, 0.0  ;;  %v1162_v12 = vmul.f32 %v2047_v0, %v1088_v8  ;;  %v1193_v13 = vsel %vm1120_vm3, %v1087_v4, %v1161_v9  ;;  %v1576_v14 = vpack.c.bf16 %v1195_v11, %v1195_v11  ;;  %v1733_v15 = vpop.f32.mrb[4].mxu0 }
 0x111   : > { %v1196_v16 = vsel %vm1123_vm4, %v1090_v6, %v1164_v10  ;;  %v1574_v17 = vpack.c.bf16 %v1193_v13, %v1193_v13  ;;  %v1765_v18 = vadd.f32 %v1733_v15, %v1665_v46  ;;  %v937_v19 = vpop.f32.mrb[5].mxu0 }
 0x112   : > { %v1194_v20 = vsel %vm1121_vm6, %v1088_v8, %v1162_v12  ;;  %v1577_v21 = vpack.c.bf16 %v1196_v16, %v1196_v16  ;;  %1356 = vst.msk [vmem:[%s2059_s7 + $0x8] sm:$0xf] %vm1353_vm5, %v1576_v14  ;;  %v1766_v22 = vadd.f32 %v937_v19, %v428_v47  ;;  %v1734_v23 = vpop.f32.mrb[6].mxu0 }
 0x113   : > { %v1575_v24 = vpack.c.bf16 %v1194_v20, %v1194_v20  ;;  %1354 = vst.msk [vmem:[%s2059_s7] sm:$0xf] %vm1353_vm5, %v1574_v17  ;;  %v1093_v25 = vadd.f32 %v1765_v18, %v2045_v59  ;;  %v1767_v26 = vadd.f32 %v1734_v23, %v1666_v48  ;;  %v940_v27 = vpop.f32.mrb[7].mxu0 }
 0x114   : > { %1357 = vst.msk [vmem:[%s2059_s7 + $0xc] sm:$0xf] %vm1353_vm5, %v1577_v21  ;;  %v1091_v28 = vadd.f32 %v1766_v22, %v2045_v59  ;;  %v1768_v29 = vadd.f32 %v940_v27, %v431_v49 }
 0x115   : > { %1355 = vst.msk [vmem:[%s2059_s7 + $0x4] sm:$0xf] %vm1353_vm5, %v1575_v24  ;;  %vm1126_vm7 = vcmp.gt.f32.partialorder %v1093_v25, 0.0  ;;  %v1167_v30 = vmul.f32 %v2047_v0, %v1093_v25  ;;  %v1094_v31 = vadd.f32 %v1767_v26, %v2045_v59 }
 0x116   : > { %vm1124_vm8 = vcmp.gt.f32.partialorder %v1091_v28, 0.0  ;;  %v1165_v32 = vmul.f32 %v2047_v0, %v1091_v28  ;;  %v1092_v33 = vadd.f32 %v1768_v29, %v2045_v59 }
 0x117   : > { %v1199_v34 = vsel %vm1126_vm7, %v1093_v25, %v1167_v30  ;;  %vm1127_vm9 = vcmp.gt.f32.partialorder %v1094_v31, 0.0  ;;  %v1168_v35 = vmul.f32 %v2047_v0, %v1094_v31 }
 0x118   : > { %v1580_v36 = vpack.c.bf16 %v1199_v34, %v1199_v34  ;;  %v1197_v37 = vsel %vm1124_vm8, %v1091_v28, %v1165_v32  ;;  %vm1125_vm10 = vcmp.gt.f32.partialorder %v1092_v33, 0.0  ;;  %v1166_v38 = vmul.f32 %v2047_v0, %v1092_v33  ;;  %v1737_v39 = vpop.f32.mrb[8].mxu0 }
 0x119   : > { %v1578_v40 = vpack.c.bf16 %v1197_v37, %v1197_v37  ;;  %v1200_v41 = vsel %vm1127_vm9, %v1094_v31, %v1168_v35  ;;  %v1769_v42 = vadd.f32 %v1737_v39, %v2026_v50  ;;  %v953_v43 = vpop.f32.mrb[9].mxu0 }
 0x11a   : > { %1360 = vst.msk [vmem:[%s2059_s7 + $0x18] sm:$0xf] %vm1353_vm5, %v1580_v36  ;;  %v1581_v44 = vpack.c.bf16 %v1200_v41, %v1200_v41  ;;  %v1198_v45 = vsel %vm1125_vm10, %v1092_v33, %v1166_v38  ;;  %v1770_v46 = vadd.f32 %v953_v43, %v2028_v51  ;;  %v1738_v47 = vpop.f32.mrb[10].mxu0 }
 0x11b   : > { %1358 = vst.msk [vmem:[%s2059_s7 + $0x10] sm:$0xf] %vm1353_vm5, %v1578_v40  ;;  %v1579_v48 = vpack.c.bf16 %v1198_v45, %v1198_v45  ;;  %v1097_v49 = vadd.f32 %v1769_v42, %v2045_v59  ;;  %v1771_v58 = vadd.f32 %v1738_v47, %v2030_v52  ;;  %v956_v60 = vpop.f32.mrb[11].mxu0 }
 0x11c   : > { %1361 = vst.msk [vmem:[%s2059_s7 + $0x1c] sm:$0xf] %vm1353_vm5, %v1581_v44  ;;  %v1095_v50 = vadd.f32 %v1770_v46, %v2045_v59  ;;  %v1772_v61 = vadd.f32 %v956_v60, %v2032_v53 }
 0x11d   : > { %1359 = vst.msk [vmem:[%s2059_s7 + $0x14] sm:$0xf] %vm1353_vm5, %v1579_v48  ;;  %vm1130_vm11 = vcmp.gt.f32.partialorder %v1097_v49, 0.0  ;;  %v1171_v51 = vmul.f32 %v2047_v0, %v1097_v49  ;;  %v1098_v62 = vadd.f32 %v1771_v58, %v2045_v59 }
 0x11e   : > { %vm1128_vm12 = vcmp.gt.f32.partialorder %v1095_v50, 0.0  ;;  %v1169_v63 = vmul.f32 %v2047_v0, %v1095_v50  ;;  %v1096_v52 = vadd.f32 %v1772_v61, %v2045_v59 }
 0x11f   : > { %v1203_v1 = vsel %vm1130_vm11, %v1097_v49, %v1171_v51  ;;  %vm1131_vm13 = vcmp.gt.f32.partialorder %v1098_v62, 0.0  ;;  %v1172_v2 = vmul.f32 %v2047_v0, %v1098_v62 }
 0x120   : > { %v1584_v3 = vpack.c.bf16 %v1203_v1, %v1203_v1  ;;  %v1201_v53 = vsel %vm1128_vm12, %v1095_v50, %v1169_v63  ;;  %vm1129_vm14 = vcmp.gt.f32.partialorder %v1096_v52, 0.0  ;;  %v1170_v4 = vmul.f32 %v2047_v0, %v1096_v52  ;;  %v1741_v5 = vpop.f32.mrb[12].mxu0 }
 0x121   : > { %v1582_v6 = vpack.c.bf16 %v1201_v53, %v1201_v53  ;;  %v1204_v7 = vsel %vm1131_vm13, %v1098_v62, %v1172_v2  ;;  %v1773_v8 = vadd.f32 %v1741_v5, %v2034_v54  ;;  %v969_v9 = vpop.f32.mrb[13].mxu0 }
 0x122   : > { %1364 = vst.msk [vmem:[%s2059_s7 + $0x28] sm:$0xf] %vm1353_vm5, %v1584_v3  ;;  %v1585_v10 = vpack.c.bf16 %v1204_v7, %v1204_v7  ;;  %v1202_v11 = vsel %vm1129_vm14, %v1096_v52, %v1170_v4  ;;  %v1774_v12 = vadd.f32 %v969_v9, %v2036_v55  ;;  %v1742_v13 = vpop.f32.mrb[14].mxu0 }
 0x123   : > { %1362 = vst.msk [vmem:[%s2059_s7 + $0x20] sm:$0xf] %vm1353_vm5, %v1582_v6  ;;  %v1583_v14 = vpack.c.bf16 %v1202_v11, %v1202_v11  ;;  %v1101_v15 = vadd.f32 %v1773_v8, %v2045_v59  ;;  %v1775_v16 = vadd.f32 %v1742_v13, %v2038_v56  ;;  %v972_v17 = vpop.f32.mrb[15].mxu0 }
 0x124   : > { %1365 = vst.msk [vmem:[%s2059_s7 + $0x2c] sm:$0xf] %vm1353_vm5, %v1585_v10  ;;  %v1099_v54 = vadd.f32 %v1774_v12, %v2045_v59  ;;  %v1776_v18 = vadd.f32 %v972_v17, %v2040_v57 }
 0x125   : > { %1363 = vst.msk [vmem:[%s2059_s7 + $0x24] sm:$0xf] %vm1353_vm5, %v1583_v14  ;;  %vm1134_vm15 = vcmp.gt.f32.partialorder %v1101_v15, 0.0  ;;  %v1175_v55 = vmul.f32 %v2047_v0, %v1101_v15  ;;  %v1102_v19 = vadd.f32 %v1775_v16, %v2045_v59 }
 0x126   : > { %vm1132_vm0 = vcmp.gt.f32.partialorder %v1099_v54, 0.0  ;;  %v1173_v20 = vmul.f32 %v2047_v0, %v1099_v54  ;;  %v1100_v56 = vadd.f32 %v1776_v18, %v2045_v59 }
 0x127   : > { %v1207_v21 = vsel %vm1134_vm15, %v1101_v15, %v1175_v55  ;;  %vm1135_vm1 = vcmp.gt.f32.partialorder %v1102_v19, 0.0  ;;  %v1176_v22 = vmul.f32 %v2047_v0, %v1102_v19 }
 0x128   : > { %v1588_v23 = vpack.c.bf16 %v1207_v21, %v1207_v21  ;;  %v1205_v24 = vsel %vm1132_vm0, %v1099_v54, %v1173_v20  ;;  %vm1133_vm2 = vcmp.gt.f32.partialorder %v1100_v56, 0.0  ;;  %v1174_v57 = vmul.f32 %v2047_v0, %v1100_v56  ;;  %v1711_v25 = vpop.f32.mrb[16].mxu1  ;;  %v1745_v26 = vpop.f32.mrb[16].mxu0 }
 0x129   : > { %v1586_v27 = vpack.c.bf16 %v1205_v24, %v1205_v24  ;;  %v1208_v28 = vsel %vm1135_vm1, %v1102_v19, %v1176_v22  ;;  %v1777_v29 = vadd.f32 %v1745_v26, %v1711_v25  ;;  %v653_v30 = vpop.f32.mrb[17].mxu1  ;;  %v985_v31 = vpop.f32.mrb[17].mxu0 }
 0x12a   : > { %1368 = vst.msk [vmem:[%s2059_s7 + $0x38] sm:$0xf] %vm1353_vm5, %v1588_v23  ;;  %v1589_v32 = vpack.c.bf16 %v1208_v28, %v1208_v28  ;;  %v1206_v33 = vsel %vm1133_vm2, %v1100_v56, %v1174_v57  ;;  %v1778_v34 = vadd.f32 %v985_v31, %v653_v30  ;;  %v1712_v35 = vpop.f32.mrb[18].mxu1  ;;  %v1746_v36 = vpop.f32.mrb[18].mxu0 }
 0x12b   : > { %1366 = vst.msk [vmem:[%s2059_s7 + $0x30] sm:$0xf] %vm1353_vm5, %v1586_v27  ;;  %v1587_v37 = vpack.c.bf16 %v1206_v33, %v1206_v33  ;;  %v1105_v38 = vadd.f32 %v1777_v29, %v2045_v59  ;;  %v1779_v39 = vadd.f32 %v1746_v36, %v1712_v35  ;;  %v656_v40 = vpop.f32.mrb[19].mxu1  ;;  %v988_v41 = vpop.f32.mrb[19].mxu0 }
 0x12c   : > { %1369 = vst.msk [vmem:[%s2059_s7 + $0x3c] sm:$0xf] %vm1353_vm5, %v1589_v32  ;;  %v1103_v42 = vadd.f32 %v1778_v34, %v2045_v59  ;;  %v1780_v43 = vadd.f32 %v988_v41, %v656_v40 }
 0x12d   : > { %1367 = vst.msk [vmem:[%s2059_s7 + $0x34] sm:$0xf] %vm1353_vm5, %v1587_v37  ;;  %vm1138_vm3 = vcmp.gt.f32.partialorder %v1105_v38, 0.0  ;;  %v1179_v44 = vmul.f32 %v2047_v0, %v1105_v38  ;;  %v1106_v45 = vadd.f32 %v1779_v39, %v2045_v59 }
 0x12e   : > { %vm1136_vm4 = vcmp.gt.f32.partialorder %v1103_v42, 0.0  ;;  %v1177_v46 = vmul.f32 %v2047_v0, %v1103_v42  ;;  %v1104_v47 = vadd.f32 %v1780_v43, %v2045_v59 }
 0x12f   : > { %v1211_v48 = vsel %vm1138_vm3, %v1105_v38, %v1179_v44  ;;  %vm1139_vm6 = vcmp.gt.f32.partialorder %v1106_v45, 0.0  ;;  %v1180_v49 = vmul.f32 %v2047_v0, %v1106_v45 }
 0x130   : > { %v1592_v58 = vpack.c.bf16 %v1211_v48, %v1211_v48  ;;  %v1209_v60 = vsel %vm1136_vm4, %v1103_v42, %v1177_v46  ;;  %vm1137_vm7 = vcmp.gt.f32.partialorder %v1104_v47, 0.0  ;;  %v1178_v50 = vmul.f32 %v2047_v0, %v1104_v47  ;;  %v1715_v61 = vpop.f32.mrb[20].mxu1  ;;  %v1749_v51 = vpop.f32.mrb[20].mxu0 }
 0x131   : > { %v1590_v62 = vpack.c.bf16 %v1209_v60, %v1209_v60  ;;  %v1212_v63 = vsel %vm1139_vm6, %v1106_v45, %v1180_v49  ;;  %v1781_v52 = vadd.f32 %v1749_v51, %v1715_v61  ;;  %v669_v1 = vpop.f32.mrb[21].mxu1  ;;  %v1001_v2 = vpop.f32.mrb[21].mxu0 }
 0x132   : > { %1372 = vst.msk [vmem:[%s2059_s7 + $0x48] sm:$0xf] %vm1353_vm5, %v1592_v58  ;;  %v1593_v3 = vpack.c.bf16 %v1212_v63, %v1212_v63  ;;  %v1210_v53 = vsel %vm1137_vm7, %v1104_v47, %v1178_v50  ;;  %v1782_v4 = vadd.f32 %v1001_v2, %v669_v1  ;;  %v1716_v5 = vpop.f32.mrb[22].mxu1  ;;  %v1750_v6 = vpop.f32.mrb[22].mxu0 }
 0x133   : > { %1370 = vst.msk [vmem:[%s2059_s7 + $0x40] sm:$0xf] %vm1353_vm5, %v1590_v62  ;;  %v1591_v7 = vpack.c.bf16 %v1210_v53, %v1210_v53  ;;  %v1109_v8 = vadd.f32 %v1781_v52, %v2045_v59  ;;  %v1783_v9 = vadd.f32 %v1750_v6, %v1716_v5  ;;  %v672_v10 = vpop.f32.mrb[23].mxu1  ;;  %v1004_v11 = vpop.f32.mrb[23].mxu0 }
 0x134   : > { %1373 = vst.msk [vmem:[%s2059_s7 + $0x4c] sm:$0xf] %vm1353_vm5, %v1593_v3  ;;  %v1107_v12 = vadd.f32 %v1782_v4, %v2045_v59  ;;  %v1784_v13 = vadd.f32 %v1004_v11, %v672_v10 }
 0x135   : > { %1371 = vst.msk [vmem:[%s2059_s7 + $0x44] sm:$0xf] %vm1353_vm5, %v1591_v7  ;;  %vm1142_vm8 = vcmp.gt.f32.partialorder %v1109_v8, 0.0  ;;  %v1183_v14 = vmul.f32 %v2047_v0, %v1109_v8  ;;  %v1110_v15 = vadd.f32 %v1783_v9, %v2045_v59 }
 0x136   : > { %vm1140_vm9 = vcmp.gt.f32.partialorder %v1107_v12, 0.0  ;;  %v1181_v16 = vmul.f32 %v2047_v0, %v1107_v12  ;;  %v1108_v17 = vadd.f32 %v1784_v13, %v2045_v59 }
 0x137   : > { %v1215_v54 = vsel %vm1142_vm8, %v1109_v8, %v1183_v14  ;;  %vm1143_vm10 = vcmp.gt.f32.partialorder %v1110_v15, 0.0  ;;  %v1184_v18 = vmul.f32 %v2047_v0, %v1110_v15 }
 0x138   : > { %v1596_v55 = vpack.c.bf16 %v1215_v54, %v1215_v54  ;;  %v1213_v19 = vsel %vm1140_vm9, %v1107_v12, %v1181_v16  ;;  %vm1141_vm11 = vcmp.gt.f32.partialorder %v1108_v17, 0.0  ;;  %v1182_v20 = vmul.f32 %v2047_v0, %v1108_v17  ;;  %v1719_v56 = vpop.f32.mrb[24].mxu1  ;;  %v1753_v21 = vpop.f32.mrb[24].mxu0 }
 0x139   : > { %v1594_v22 = vpack.c.bf16 %v1213_v19, %v1213_v19  ;;  %v1216_v23 = vsel %vm1143_vm10, %v1110_v15, %v1184_v18  ;;  %v1785_v24 = vadd.f32 %v1753_v21, %v1719_v56  ;;  %v685_v57 = vpop.f32.mrb[25].mxu1  ;;  %v1017_v25 = vpop.f32.mrb[25].mxu0 }
 0x13a   : > { %1376 = vst.msk [vmem:[%s2059_s7 + $0x58] sm:$0xf] %vm1353_vm5, %v1596_v55  ;;  %v1597_v26 = vpack.c.bf16 %v1216_v23, %v1216_v23  ;;  %v1214_v27 = vsel %vm1141_vm11, %v1108_v17, %v1182_v20  ;;  %v1786_v28 = vadd.f32 %v1017_v25, %v685_v57  ;;  %v1720_v29 = vpop.f32.mrb[26].mxu1  ;;  %v1754_v30 = vpop.f32.mrb[26].mxu0 }
 0x13b   : > { %1374 = vst.msk [vmem:[%s2059_s7 + $0x50] sm:$0xf] %vm1353_vm5, %v1594_v22  ;;  %v1595_v31 = vpack.c.bf16 %v1214_v27, %v1214_v27  ;;  %v1113_v32 = vadd.f32 %v1785_v24, %v2045_v59  ;;  %v1787_v33 = vadd.f32 %v1754_v30, %v1720_v29  ;;  %v688_v34 = vpop.f32.mrb[27].mxu1  ;;  %v1020_v35 = vpop.f32.mrb[27].mxu0 }
 0x13c   : > { %1377 = vst.msk [vmem:[%s2059_s7 + $0x5c] sm:$0xf] %vm1353_vm5, %v1597_v26  ;;  %v1111_v36 = vadd.f32 %v1786_v28, %v2045_v59  ;;  %v1788_v37 = vadd.f32 %v1020_v35, %v688_v34 }
 0x13d   : > { %1375 = vst.msk [vmem:[%s2059_s7 + $0x54] sm:$0xf] %vm1353_vm5, %v1595_v31  ;;  %vm1146_vm12 = vcmp.gt.f32.partialorder %v1113_v32, 0.0  ;;  %v1187_v38 = vmul.f32 %v2047_v0, %v1113_v32  ;;  %v1114_v39 = vadd.f32 %v1787_v33, %v2045_v59 }
 0x13e   : > { %vm1144_vm13 = vcmp.gt.f32.partialorder %v1111_v36, 0.0  ;;  %v1185_v40 = vmul.f32 %v2047_v0, %v1111_v36  ;;  %v1112_v41 = vadd.f32 %v1788_v37, %v2045_v59 }
 0x13f   : > { %v1219_v42 = vsel %vm1146_vm12, %v1113_v32, %v1187_v38  ;;  %vm1147_vm14 = vcmp.gt.f32.partialorder %v1114_v39, 0.0  ;;  %v1188_v43 = vmul.f32 %v2047_v0, %v1114_v39 }
 0x140   : > { %v1600_v44 = vpack.c.bf16 %v1219_v42, %v1219_v42  ;;  %v1217_v45 = vsel %vm1144_vm13, %v1111_v36, %v1185_v40  ;;  %vm1145_vm15 = vcmp.gt.f32.partialorder %v1112_v41, 0.0  ;;  %v1186_v46 = vmul.f32 %v2047_v0, %v1112_v41  ;;  %v1723_v47 = vpop.f32.mrb[28].mxu1  ;;  %v1757_v48 = vpop.f32.mrb[28].mxu0 }
 0x141   : > { %v1598_v49 = vpack.c.bf16 %v1217_v45, %v1217_v45  ;;  %v1220_v58 = vsel %vm1147_vm14, %v1114_v39, %v1188_v43  ;;  %v1789_v60 = vadd.f32 %v1757_v48, %v1723_v47  ;;  %v701_v50 = vpop.f32.mrb[29].mxu1  ;;  %v1033_v61 = vpop.f32.mrb[29].mxu0 }
 0x142   : > { %1380 = vst.msk [vmem:[%s2059_s7 + $0x68] sm:$0xf] %vm1353_vm5, %v1600_v44  ;;  %v1601_v51 = vpack.c.bf16 %v1220_v58, %v1220_v58  ;;  %v1218_v62 = vsel %vm1145_vm15, %v1112_v41, %v1186_v46  ;;  %v1790_v63 = vadd.f32 %v1033_v61, %v701_v50  ;;  %v1724_v52 = vpop.f32.mrb[30].mxu1  ;;  %v1758_v1 = vpop.f32.mrb[30].mxu0 }
 0x143   : > { %1378 = vst.msk [vmem:[%s2059_s7 + $0x60] sm:$0xf] %vm1353_vm5, %v1598_v49  ;;  %v1599_v2 = vpack.c.bf16 %v1218_v62, %v1218_v62  ;;  %v1117_v3 = vadd.f32 %v1789_v60, %v2045_v59  ;;  %v1791_v53 = vadd.f32 %v1758_v1, %v1724_v52  ;;  %v704_v4 = vpop.f32.mrb[31].mxu1  ;;  %v1036_v5 = vpop.f32.mrb[31].mxu0 }
 0x144   : > { %1381 = vst.msk [vmem:[%s2059_s7 + $0x6c] sm:$0xf] %vm1353_vm5, %v1601_v51  ;;  %v1115_v6 = vadd.f32 %v1790_v63, %v2045_v59  ;;  %v1792_v7 = vadd.f32 %v1036_v5, %v704_v4 }
 0x145   : > { %1379 = vst.msk [vmem:[%s2059_s7 + $0x64] sm:$0xf] %vm1353_vm5, %v1599_v2  ;;  %vm1150_vm0 = vcmp.gt.f32.partialorder %v1117_v3, 0.0  ;;  %v1191_v8 = vmul.f32 %v2047_v0, %v1117_v3  ;;  %v1118_v9 = vadd.f32 %v1791_v53, %v2045_v59 }
 0x146   : > { %vm1148_vm1 = vcmp.gt.f32.partialorder %v1115_v6, 0.0  ;;  %v1189_v10 = vmul.f32 %v2047_v0, %v1115_v6  ;;  %v1116_v11 = vadd.f32 %v1792_v7, %v2045_v59 }
 0x147   : > { %v1223_v12 = vsel %vm1150_vm0, %v1117_v3, %v1191_v8  ;;  %vm1151_vm2 = vcmp.gt.f32.partialorder %v1118_v9, 0.0  ;;  %v1192_v13 = vmul.f32 %v2047_v0, %v1118_v9 }
 0x148   : > { %v1604_v14 = vpack.c.bf16 %v1223_v12, %v1223_v12  ;;  %v1221_v15 = vsel %vm1148_vm1, %v1115_v6, %v1189_v10  ;;  %vm1149_vm3 = vcmp.gt.f32.partialorder %v1116_v11, 0.0  ;;  %v1190_v16 = vmul.f32 %v2047_v0, %v1116_v11 }
 0x149   : > { %v1602_v17 = vpack.c.bf16 %v1221_v15, %v1221_v15  ;;  %v1224_v54 = vsel %vm1151_vm2, %v1118_v9, %v1192_v13 }
 0x14a   : > { %1384 = vst.msk [vmem:[%s2059_s7 + $0x78] sm:$0xf] %vm1353_vm5, %v1604_v14  ;;  %v1605_v18 = vpack.c.bf16 %v1224_v54, %v1224_v54  ;;  %v1222_v55 = vsel %vm1149_vm3, %v1116_v11, %v1190_v16 }
 0x14b   : > { %1382 = vst.msk [vmem:[%s2059_s7 + $0x70] sm:$0xf] %vm1353_vm5, %v1602_v17  ;;  %v1603_v19 = vpack.c.bf16 %v1222_v55, %v1222_v55 }
 0x14c   : > { %1385 = vst.msk [vmem:[%s2059_s7 + $0x7c] sm:$0xf] %vm1353_vm5, %v1605_v18 }
 0x14d   : > { %1383 = vst.msk [vmem:[%s2059_s7 + $0x74] sm:$0xf] %vm1353_vm5, %v1603_v19 }
 0x14e PF: > { %s16_s17 = sadd.s32 1, %s1882_s17  }
 0x14f   : > { %p13_p4 = scmp.ge.s32.totalorder %s16_s17, 4  }
 0x151   :  { %15 = sbr.rel (!%p13_p4) target bundleno = 3 (0x3), region = 68 }

</bundles_post_ra>
